<compile_context>
chip_gen: v5e
topology: v5e:2x2
jax: 0.10.0
libtpu: 0.0.40
codegen_flags: <defaults>
</compile_context>

<pallas_src>
import functools
import math

import jax
import jax.numpy as jnp
from jax.experimental import pallas as pl
from jax.experimental.pallas import tpu as pltpu

LN_EPS = 1e-5


# ----------------------------------------------------------------------------
# Fused kernel: one grid step = (batch-tile, layer).  The residual stream is
# carried in `x_scratch` across the layer axis (innermost, "arbitrary").
# ----------------------------------------------------------------------------
def transformer_kernel(*args, n_head, has_mask, compute_dtype, approx_recip):
    x_scratch = args[-1]                 # VMEM (Bt, S, E) f32 residual stream
    o_ref = args[-2]                     # (Bt, S, E) output block
    if has_mask:
        x_ref, mask_ref = args[0], args[1]
        w_refs = args[2:-2]
    else:
        x_ref, mask_ref = args[0], None
        w_refs = args[1:-2]
    (ln1_w_ref, ln1_b_ref,               # (1, 1, E)
     wqkv_ref, bqkv_ref,                 # (1, E, 3E) / (1, 1, 3E)  [Q pre-scaled]
     wo_ref, bo_ref,                     # (1, E, E)  / (1, 1, E)
     ln2_w_ref, ln2_b_ref,               # (1, 1, E)
     wfc_ref, bfc_ref,                   # (1, E, 4E) / (1, 1, 4E)
     wproj_ref, bproj_ref) = w_refs      # (1, 4E, E) / (1, 1, E)

    l = pl.program_id(1)

    @pl.when(l == 0)
    def _():
        x_scratch[...] = x_ref[...].astype(jnp.float32)

    Bt, S, E = x_scratch.shape
    d_head = E // n_head
    x = x_scratch[...].reshape(Bt * S, E)          # (Bt*S, E) f32

    def layer_norm(h, w_ref, b_ref):               # f32 math (LayerNorm wrapper)
        mu = jnp.mean(h, axis=-1, keepdims=True)
        var = jnp.mean((h - mu) ** 2, axis=-1, keepdims=True)
        return (h - mu) * jax.lax.rsqrt(var + LN_EPS) * w_ref[0] + b_ref[0]

    # ---- attention branch ----------------------------------------------------
    h = layer_norm(x, ln1_w_ref, ln1_b_ref)                             # (Bt*S, E)
    qkv = jnp.dot(h.astype(compute_dtype), wqkv_ref[0],
                  preferred_element_type=jnp.float32) + bqkv_ref[0]     # (Bt*S, 3E)

    def split_heads(t):        # (Bt*S, E) -> (Bt*H, S, Dh); PyTorch head layout
        t = t.reshape(Bt, S, n_head, d_head)
        return jnp.transpose(t, (0, 2, 1, 3)).reshape(Bt * n_head, S, d_head)

    q = split_heads(qkv[:, :E]).astype(compute_dtype)    # scale folded into W_q
    k = split_heads(qkv[:, E:2 * E]).astype(compute_dtype)
    v = split_heads(qkv[:, 2 * E:]).astype(compute_dtype)

    s = jnp.einsum("bqd,bkd->bqk", q, k,
                   preferred_element_type=jnp.float32)                  # (Bt*H, S, S)
    s = s.reshape(Bt, n_head, S, S)
    if has_mask:
        # key_padding_mask as additive bias. -1e9 underflows to exactly 0 after
        # exp(); a fully-masked key row yields a uniform distribution instead
        # of PyTorch's NaN.
        s = s + mask_ref[...][:, :, None, :]             # (Bt,1,1,S) broadcast
    s = s - jnp.max(s, axis=-1, keepdims=True)
    p = jnp.exp(s)
    p = p * pl.reciprocal(jnp.sum(p, axis=-1, keepdims=True), approx=approx_recip)
    p = p.reshape(Bt * n_head, S, S)

    o = jnp.einsum("bqk,bkd->bqd", p.astype(compute_dtype), v,
                   preferred_element_type=jnp.float32)                  # (Bt*H, S, Dh)
    o = jnp.transpose(o.reshape(Bt, n_head, S, d_head), (0, 2, 1, 3))
    o = o.reshape(Bt * S, E)                                            # merge heads
    attn = jnp.dot(o.astype(compute_dtype), wo_ref[0],
                   preferred_element_type=jnp.float32) + bo_ref[0]
    x = x + attn

    # ---- MLP branch ------------------------------------------------------------
    h2 = layer_norm(x, ln2_w_ref, ln2_b_ref)
    hidden = jnp.dot(h2.astype(compute_dtype), wfc_ref[0],
                     preferred_element_type=jnp.float32) + bfc_ref[0]   # (Bt*S, 4E)
    hidden = hidden * jax.nn.sigmoid(1.702 * hidden)                    # QuickGELU
    mlp = jnp.dot(hidden.astype(compute_dtype), wproj_ref[0],
                  preferred_element_type=jnp.float32) + bproj_ref[0]
    x = x + mlp

    x_scratch[...] = x.reshape(Bt, S, E)

    @pl.when(l == pl.num_programs(1) - 1)
    def _():
        o_ref[...] = x.reshape(Bt, S, E).astype(o_ref.dtype)


# ----------------------------------------------------------------------------
# Full Transformer forward: x of shape (S, B, E), padding_mask (B, S) bool or
# None.  Returns (x, padding_mask) like the PyTorch module's tuple output.
# ----------------------------------------------------------------------------
def transformer_forward(x_sbe, padding_mask, params, n_head,
                        compute_dtype=jnp.bfloat16, b_tile=None):
    S, B, E = x_sbe.shape
    L = params["wqkv_t"].shape[0]
    has_mask = padding_mask is not None

    # Default: whole batch in one block (max weight-DMA reuse, single-TC chips).
    # On v7x (2 TensorCores) pass b_tile = B // 2 so the "parallel" batch-tile
    # axis has >= 2 iterations and both cores are used.
    if b_tile is None:
        b_tile = B
    assert B % b_tile == 0, "b_tile must divide batch"
    nb = B // b_tile

    x_bse = jnp.transpose(x_sbe, (1, 0, 2))                            # (B, S, E)

    def act_spec(shape):                  # indexed by batch tile, fixed across l
        return pl.BlockSpec(shape, lambda b, l: (b, 0, 0))

    def w_spec(shape):                    # indexed by layer
        return pl.BlockSpec(shape, lambda b, l: (l, 0, 0))

    inputs = [x_bse]
    in_specs = [act_spec((b_tile, S, E))]
    if has_mask:
        mask_bias = jnp.where(padding_mask, -1e9, 0.0).astype(jnp.float32)
        inputs.append(mask_bias.reshape(B, 1, S))
        in_specs.append(act_spec((b_tile, 1, S)))
    for name in ("ln1_w", "ln1_b", "wqkv_t", "bqkv", "wo_t", "bo",
                 "ln2_w", "ln2_b", "wfc_t", "bfc", "wproj_t", "bproj"):
        arr = params[name]
        inputs.append(arr)
        in_specs.append(w_spec((1,) + arr.shape[1:]))

    # VMEM budget: double-buffered per-layer weights + activation slabs + slack,
    # capped at ~80% of physical VMEM (v7x 64 MiB -> ~51 MiB, v5e/v6e 128 MiB
    # -> ~102 MiB) so the compiler keeps headroom for its own scratch.
    itemsize = jnp.dtype(compute_dtype).itemsize
    w_bytes = 12 * E * E * itemsize + 14 * E * 4
    act_bytes = 4 * b_tile * (3 * S * E + 4 * S * E + n_head * S * S + S)
    try:
        phys_vmem = pltpu.get_tpu_info().vmem_capacity_bytes
    except Exception:                      # no TPU visible (e.g. interpret/CPU)
        phys_vmem = 128 * 2 ** 20
    vmem_limit = int(min(0.8 * phys_vmem,
                         max(32 * 2 ** 20, 2 * w_bytes + 2 * act_bytes + (4 << 20))))

    kernel = functools.partial(
        transformer_kernel,
        n_head=n_head,
        has_mask=has_mask,
        compute_dtype=compute_dtype,
        approx_recip=(jnp.dtype(compute_dtype) != jnp.dtype(jnp.float32)),
    )

    out = pl.pallas_call(
        kernel,
        out_shape=jax.ShapeDtypeStruct((B, S, E), x_bse.dtype),
        grid_spec=pltpu.PrefetchScalarGridSpec(
            num_scalar_prefetch=0,
            grid=(nb, L),
            in_specs=in_specs,
            out_specs=pl.BlockSpec((b_tile, S, E), lambda b, l: (b, 0, 0)),
            scratch_shapes=[pltpu.VMEM((b_tile, S, E), jnp.float32)],
        ),
        compiler_params=pltpu.CompilerParams(
            dimension_semantics=("parallel", "arbitrary"),
            vmem_limit_bytes=vmem_limit,
        ),
    )(*inputs)

    return jnp.transpose(out, (1, 0, 2)), padding_mask


# ----------------------------------------------------------------------------
# Parameters in native PyTorch layouts, plus host-side stacking / transposes.
# ----------------------------------------------------------------------------
def init_torch_params(key, width, layers):
    E = width
    out = []
    for _ in range(layers):
        key, *ks = jax.random.split(key, 13)          # 12 independent param keys
        out.append({
            "ln1_w": 1.0 + 0.1 * jax.random.normal(ks[0], (E,), jnp.float32),
            "ln1_b": 0.02 * jax.random.normal(ks[1], (E,), jnp.float32),
            "in_proj_weight": 0.02 * jax.random.normal(ks[2], (3 * E, E), jnp.float32),
            "in_proj_bias": 0.02 * jax.random.normal(ks[3], (3 * E,), jnp.float32),
            "out_proj_weight": 0.02 * jax.random.normal(ks[4], (E, E), jnp.float32),
            "out_proj_bias": 0.02 * jax.random.normal(ks[5], (E,), jnp.float32),
            "ln2_w": 1.0 + 0.1 * jax.random.normal(ks[6], (E,), jnp.float32),
            "ln2_b": 0.02 * jax.random.normal(ks[7], (E,), jnp.float32),
            "c_fc_weight": 0.02 * jax.random.normal(ks[8], (4 * E, E), jnp.float32),
            "c_fc_bias": 0.02 * jax.random.normal(ks[9], (4 * E,), jnp.float32),
            "c_proj_weight": 0.02 * jax.random.normal(ks[10], (E, 4 * E), jnp.float32),
            "c_proj_bias": 0.02 * jax.random.normal(ks[11], (E,), jnp.float32),
        })
    return out


def prepare_params(torch_layers, n_head, compute_dtype):
    """Stack per-layer params along a leading layer axis, pre-transpose all
    weight matrices so every in-kernel matmul contracts over the RHS leading
    dim (no in-kernel .T), and fold the 1/sqrt(d_head) attention scale into
    the Q third of the in-projection weight/bias (host-side constant fold)."""
    L = len(torch_layers)
    E = torch_layers[0]["ln1_w"].shape[0]
    d_head = E // n_head
    stack = lambda name: jnp.stack([p[name] for p in torch_layers])
    wd = compute_dtype

    wqkv_t = jnp.transpose(stack("in_proj_weight"), (0, 2, 1))        # (L, E, 3E)
    bqkv = stack("in_proj_bias")                                      # (L, 3E)
    q_scale = jnp.concatenate(
        [jnp.full((E,), 1.0 / math.sqrt(d_head), jnp.float32),
         jnp.ones((2 * E,), jnp.float32)])
    wqkv_t = wqkv_t * q_scale[None, None, :]
    bqkv = bqkv * q_scale[None, :]

    # TODO(synk): on v7x consider fp8 (e4m3 + per-channel scales) storage for
    # the four big weight matrices to halve weight DMA / VMEM footprint.
    return {
        "ln1_w": stack("ln1_w").reshape(L, 1, E),
        "ln1_b": stack("ln1_b").reshape(L, 1, E),
        "wqkv_t": wqkv_t.astype(wd),
        "bqkv": bqkv.reshape(L, 1, 3 * E),
        "wo_t": jnp.transpose(stack("out_proj_weight"), (0, 2, 1)).astype(wd),
        "bo": stack("out_proj_bias").reshape(L, 1, E),
        "ln2_w": stack("ln2_w").reshape(L, 1, E),
        "ln2_b": stack("ln2_b").reshape(L, 1, E),
        "wfc_t": jnp.transpose(stack("c_fc_weight"), (0, 2, 1)).astype(wd),
        "bfc": stack("c_fc_bias").reshape(L, 1, 4 * E),
        "wproj_t": jnp.transpose(stack("c_proj_weight"), (0, 2, 1)).astype(wd),
        "bproj": stack("c_proj_bias").reshape(L, 1, E),
    }


# ----------------------------------------------------------------------------
# Pure-JAX f32 reference mirroring PyTorch semantics (correctness check).
# ----------------------------------------------------------------------------
def reference_forward(x_sbe, padding_mask, torch_layers, n_head):
    S, B, E = x_sbe.shape
    d_head = E // n_head
    x = jnp.transpose(x_sbe, (1, 0, 2))                               # (B, S, E)
    if padding_mask is not None:
        bias = jnp.where(padding_mask, -1e9, 0.0)[:, None, None, :]
    else:
        bias = 0.0

    def ln(h, w, b):
        mu = jnp.mean(h, -1, keepdims=True)
        var = jnp.mean((h - mu) ** 2, -1, keepdims=True)
        return (h - mu) / jnp.sqrt(var + LN_EPS) * w + b

    for p in torch_layers:
        h = ln(x, p["ln1_w"], p["ln1_b"])
        qkv = h @ p["in_proj_weight"].T + p["in_proj_bias"]
        q, k, v = jnp.split(qkv, 3, axis=-1)
        rs = lambda t: t.reshape(B, S, n_head, d_head).transpose(0, 2, 1, 3)
        q, k, v = rs(q), rs(k), rs(v)
        s = jnp.einsum("bhqd,bhkd->bhqk", q, k) / math.sqrt(d_head) + bias
        pm = jax.nn.softmax(s, axis=-1)
        o = jnp.einsum("bhqk,bhkd->bhqd", pm, v)
        o = o.transpose(0, 2, 1, 3).reshape(B, S, E)
        x = x + (o @ p["out_proj_weight"].T + p["out_proj_bias"])
        h2 = ln(x, p["ln2_w"], p["ln2_b"])
        hid = h2 @ p["c_fc_weight"].T + p["c_fc_bias"]
        hid = hid * jax.nn.sigmoid(1.702 * hid)
        x = x + (hid @ p["c_proj_weight"].T + p["c_proj_bias"])
    return jnp.transpose(x, (1, 0, 2))


if __name__ == "__main__":
    WIDTH, LAYERS, HEADS = 32, 2, 4
    SEQ, BATCH = 8, 2

    key = jax.random.PRNGKey(0)
    k_x, k_p = jax.random.split(key)
    x = jax.random.normal(k_x, (SEQ, BATCH, WIDTH), jnp.float32)       # (S, B, E)

    # key_padding_mask: True = ignore that key (last two keys of batch 1 masked)
    padding_mask = jnp.zeros((BATCH, SEQ), dtype=bool)
    padding_mask = padding_mask.at[1, -2:].set(True)

    torch_layers = init_torch_params(k_p, WIDTH, LAYERS)
    ref = reference_forward(x, padding_mask, torch_layers, HEADS)

    # 1) exact-semantics configuration (f32 matmuls, exact softmax reciprocal)
    params_f32 = prepare_params(torch_layers, HEADS, jnp.float32)
    out_f32, mask_out = transformer_forward(
        x, padding_mask, params_f32, HEADS, compute_dtype=jnp.float32)
    out_f32 = jax.block_until_ready(out_f32)
    assert out_f32.shape == (SEQ, BATCH, WIDTH)
    assert mask_out.shape == (BATCH, SEQ)
    assert jnp.allclose(out_f32, ref, atol=2e-3, rtol=2e-3), "f32 mismatch vs ref"

    # 2) performance configuration (bf16 matmuls + approx softmax reciprocal)
    params_bf16 = prepare_params(torch_layers, HEADS, jnp.bfloat16)
    out_bf16, _ = transformer_forward(
        x, padding_mask, params_bf16, HEADS, compute_dtype=jnp.bfloat16)
    out_bf16 = jax.block_until_ready(out_bf16)
    assert jnp.allclose(out_bf16, ref, atol=3e-2, rtol=3e-2), "bf16 mismatch vs ref"

    # 3) no-padding-mask specialization (mask DMA + bias add skipped statically)
    ref_nm = reference_forward(x, None, torch_layers, HEADS)
    out_nm, _ = transformer_forward(x, None, params_f32, HEADS,
                                    compute_dtype=jnp.float32)
    out_nm = jax.block_until_ready(out_nm)
    assert jnp.allclose(out_nm, ref_nm, atol=2e-3, rtol=2e-3), "no-mask mismatch"

    print("KERNEL_OK")
</pallas_src>

<mosaic_0001>
module attributes {stable_mosaic.version = 11 : i64} {
  func.func @transformer_kernel(%arg0: i32, %arg1: i32, %arg2: memref<2x8x32xf32, #tpu.memory_space<vmem>>, %arg3: memref<2x1x8xf32, #tpu.memory_space<vmem>>, %arg4: memref<1x1x32xf32, #tpu.memory_space<vmem>>, %arg5: memref<1x1x32xf32, #tpu.memory_space<vmem>>, %arg6: memref<1x32x96xf32, #tpu.memory_space<vmem>>, %arg7: memref<1x1x96xf32, #tpu.memory_space<vmem>>, %arg8: memref<1x32x32xf32, #tpu.memory_space<vmem>>, %arg9: memref<1x1x32xf32, #tpu.memory_space<vmem>>, %arg10: memref<1x1x32xf32, #tpu.memory_space<vmem>>, %arg11: memref<1x1x32xf32, #tpu.memory_space<vmem>>, %arg12: memref<1x32x128xf32, #tpu.memory_space<vmem>>, %arg13: memref<1x1x128xf32, #tpu.memory_space<vmem>>, %arg14: memref<1x128x32xf32, #tpu.memory_space<vmem>>, %arg15: memref<1x1x32xf32, #tpu.memory_space<vmem>>, %arg16: memref<2x8x32xf32, #tpu.memory_space<vmem>>, %arg17: memref<2x8x32xf32, #tpu.memory_space<vmem>>) attributes {dimension_semantics = [#tpu.dimension_semantics<parallel>, #tpu.dimension_semantics<arbitrary>], iteration_bounds = array<i64: 1, 2>, scalar_prefetch = 0 : i64, scratch_operands = 1 : i64, tpu.core_type = #tpu.core_type<tc>, window_params = [{transform_indices = @transform_0, window_bounds = array<i64: 2, 8, 32>}, {transform_indices = @transform_1, window_bounds = array<i64: 2, 1, 8>}, {transform_indices = @transform_2, window_bounds = array<i64: 1, 1, 32>}, {transform_indices = @transform_3, window_bounds = array<i64: 1, 1, 32>}, {transform_indices = @transform_4, window_bounds = array<i64: 1, 32, 96>}, {transform_indices = @transform_5, window_bounds = array<i64: 1, 1, 96>}, {transform_indices = @transform_6, window_bounds = array<i64: 1, 32, 32>}, {transform_indices = @transform_7, window_bounds = array<i64: 1, 1, 32>}, {transform_indices = @transform_8, window_bounds = array<i64: 1, 1, 32>}, {transform_indices = @transform_9, window_bounds = array<i64: 1, 1, 32>}, {transform_indices = @transform_10, window_bounds = array<i64: 1, 32, 128>}, {transform_indices = @transform_11, window_bounds = array<i64: 1, 1, 128>}, {transform_indices = @transform_12, window_bounds = array<i64: 1, 128, 32>}, {transform_indices = @transform_13, window_bounds = array<i64: 1, 1, 32>}, {transform_indices = @transform_14, window_bounds = array<i64: 2, 8, 32>}]} {
    %c0_i32 = arith.constant 0 : i32
    %0 = arith.cmpi eq, %arg1, %c0_i32 : i32
    %1 = arith.extui %0 : i1 to i32
    %c0_i32_0 = arith.constant 0 : i32
    %2 = arith.cmpi ne, %1, %c0_i32_0 : i32
    scf.if %2 {
      %c0_65 = arith.constant 0 : index
      %c0_66 = arith.constant 0 : index
      %c0_67 = arith.constant 0 : index
      %133 = vector.load %arg2[%c0_65, %c0_66, %c0_67] : memref<2x8x32xf32, #tpu.memory_space<vmem>>, vector<2x8x32xf32>
      %c0_68 = arith.constant 0 : index
      %c0_69 = arith.constant 0 : index
      %c0_70 = arith.constant 0 : index
      %134 = vector.load %arg17[%c0_68, %c0_69, %c0_70] : memref<2x8x32xf32, #tpu.memory_space<vmem>>, vector<2x8x32xf32>
      tpu.vector_store %arg17[%c0_68, %c0_69, %c0_70], %133 {strides = array<i32>} : memref<2x8x32xf32, #tpu.memory_space<vmem>>, vector<2x8x32xf32>,
    } else {
    }
    %c0 = arith.constant 0 : index
    %c0_1 = arith.constant 0 : index
    %c0_2 = arith.constant 0 : index
    %3 = vector.load %arg17[%c0, %c0_1, %c0_2] : memref<2x8x32xf32, #tpu.memory_space<vmem>>, vector<2x8x32xf32>
    %4 = vector.shape_cast %3 : vector<2x8x32xf32> to vector<16x32xf32>
    %cst = arith.constant dense<0.000000e+00> : vector<16xf32>
    %5 = vector.multi_reduction <add>, %4, %cst [1] : vector<16x32xf32> to vector<16xf32>
    %6 = vector.shape_cast %5 : vector<16xf32> to vector<16x1xf32>
    %cst_3 = arith.constant 3.200000e+01 : f32
    %7 = vector.broadcast %cst_3 : f32 to vector<16x1xf32>
    %8 = arith.divf %6, %7 : vector<16x1xf32>
    %9 = vector.broadcast %8 : vector<16x1xf32> to vector<16x32xf32>
    %10 = arith.subf %4, %9 : vector<16x32xf32>
    %11 = arith.mulf %10, %10 : vector<16x32xf32>
    %cst_4 = arith.constant dense<0.000000e+00> : vector<16xf32>
    %12 = vector.multi_reduction <add>, %11, %cst_4 [1] : vector<16x32xf32> to vector<16xf32>
    %13 = vector.shape_cast %12 : vector<16xf32> to vector<16x1xf32>
    %cst_5 = arith.constant 3.200000e+01 : f32
    %14 = vector.broadcast %cst_5 : f32 to vector<16x1xf32>
    %15 = arith.divf %13, %14 : vector<16x1xf32>
    %16 = vector.broadcast %8 : vector<16x1xf32> to vector<16x32xf32>
    %17 = arith.subf %4, %16 : vector<16x32xf32>
    %cst_6 = arith.constant 9.99999974E-6 : f32
    %18 = vector.broadcast %cst_6 : f32 to vector<16x1xf32>
    %19 = arith.addf %15, %18 : vector<16x1xf32>
    %20 = math.rsqrt %19 : vector<16x1xf32>
    %21 = vector.broadcast %20 : vector<16x1xf32> to vector<16x32xf32>
    %22 = arith.mulf %17, %21 : vector<16x32xf32>
    %c0_7 = arith.constant 0 : index
    %c0_8 = arith.constant 0 : index
    %c0_9 = arith.constant 0 : index
    %23 = vector.load %arg4[%c0_7, %c0_8, %c0_9] : memref<1x1x32xf32, #tpu.memory_space<vmem>>, vector<1x1x32xf32>
    %24 = vector.shape_cast %23 : vector<1x1x32xf32> to vector<1x32xf32>
    %25 = vector.broadcast %24 : vector<1x32xf32> to vector<16x32xf32>
    %26 = arith.mulf %22, %25 : vector<16x32xf32>
    %c0_10 = arith.constant 0 : index
    %c0_11 = arith.constant 0 : index
    %c0_12 = arith.constant 0 : index
    %27 = vector.load %arg5[%c0_10, %c0_11, %c0_12] : memref<1x1x32xf32, #tpu.memory_space<vmem>>, vector<1x1x32xf32>
    %28 = vector.shape_cast %27 : vector<1x1x32xf32> to vector<1x32xf32>
    %29 = vector.broadcast %28 : vector<1x32xf32> to vector<16x32xf32>
    %30 = arith.addf %26, %29 : vector<16x32xf32>
    %c0_13 = arith.constant 0 : index
    %c0_14 = arith.constant 0 : index
    %c0_15 = arith.constant 0 : index
    %31 = vector.load %arg6[%c0_13, %c0_14, %c0_15] : memref<1x32x96xf32, #tpu.memory_space<vmem>>, vector<1x32x96xf32>
    %32 = vector.shape_cast %31 : vector<1x32x96xf32> to vector<32x96xf32>
    %cst_16 = arith.constant dense<0.000000e+00> : vector<16x96xf32>
    %33 = tpu.matmul %30, %32, %cst_16 {dimension_numbers = #tpu.dot_dimension_numbers<[1], [0], [0], [1], [0, 0, 1, 1], [], []>} : vector<16x32xf32>, vector<32x96xf32>, vector<16x96xf32> -> vector<16x96xf32>
    %c0_17 = arith.constant 0 : index
    %c0_18 = arith.constant 0 : index
    %c0_19 = arith.constant 0 : index
    %34 = vector.load %arg7[%c0_17, %c0_18, %c0_19] : memref<1x1x96xf32, #tpu.memory_space<vmem>>, vector<1x1x96xf32>
    %35 = vector.shape_cast %34 : vector<1x1x96xf32> to vector<1x96xf32>
    %36 = vector.broadcast %35 : vector<1x96xf32> to vector<16x96xf32>
    %37 = arith.addf %33, %36 : vector<16x96xf32>
    %38 = vector.extract_strided_slice %37 {offsets = [0, 0], sizes = [16, 32], strides = [1, 1]} : vector<16x96xf32> to vector<16x32xf32>
    %39 = vector.shape_cast %38 : vector<16x32xf32> to vector<2x8x4x8xf32>
    %40 = tpu.transpose %39, [0, 2, 1, 3] : vector<2x8x4x8xf32> -> vector<2x4x8x8xf32>
    %41 = vector.shape_cast %40 : vector<2x4x8x8xf32> to vector<8x8x8xf32>
    %42 = vector.extract_strided_slice %37 {offsets = [0, 32], sizes = [16, 32], strides = [1, 1]} : vector<16x96xf32> to vector<16x32xf32>
    %43 = vector.shape_cast %42 : vector<16x32xf32> to vector<2x8x4x8xf32>
    %44 = tpu.transpose %43, [0, 2, 1, 3] : vector<2x8x4x8xf32> -> vector<2x4x8x8xf32>
    %45 = vector.shape_cast %44 : vector<2x4x8x8xf32> to vector<8x8x8xf32>
    %46 = vector.extract_strided_slice %37 {offsets = [0, 64], sizes = [16, 32], strides = [1, 1]} : vector<16x96xf32> to vector<16x32xf32>
    %47 = vector.shape_cast %46 : vector<16x32xf32> to vector<2x8x4x8xf32>
    %48 = tpu.transpose %47, [0, 2, 1, 3] : vector<2x8x4x8xf32> -> vector<2x4x8x8xf32>
    %49 = vector.shape_cast %48 : vector<2x4x8x8xf32> to vector<8x8x8xf32>
    "tpu.trace_start"() <{level = 10 : i32, message = "bqd,bkd->bqk"}> : () -> ()
    %cst_20 = arith.constant dense<0.000000e+00> : vector<8x8x8xf32>
    %50 = tpu.matmul %41, %45, %cst_20 {dimension_numbers = #tpu.dot_dimension_numbers<[2], [2], [1], [1], [0, 0, 0, 1, 1, 1], [0], [0]>} : vector<8x8x8xf32>, vector<8x8x8xf32>, vector<8x8x8xf32> -> vector<8x8x8xf32>
    "tpu.trace_stop"() : () -> ()
    %51 = vector.shape_cast %50 : vector<8x8x8xf32> to vector<2x4x8x8xf32>
    %c0_21 = arith.constant 0 : index
    %c0_22 = arith.constant 0 : index
    %c0_23 = arith.constant 0 : index
    %52 = vector.load %arg3[%c0_21, %c0_22, %c0_23] : memref<2x1x8xf32, #tpu.memory_space<vmem>>, vector<2x1x8xf32>
    %53 = vector.shape_cast %52 : vector<2x1x8xf32> to vector<2x1x1x8xf32>
    %54 = vector.broadcast %53 : vector<2x1x1x8xf32> to vector<2x4x8x8xf32>
    %55 = arith.addf %51, %54 : vector<2x4x8x8xf32>
    %cst_24 = arith.constant dense<0xFF800000> : vector<2x4x8xf32>
    %56 = vector.multi_reduction <maximumf>, %55, %cst_24 [3] : vector<2x4x8x8xf32> to vector<2x4x8xf32>
    %57 = vector.shape_cast %56 : vector<2x4x8xf32> to vector<2x4x8x1xf32>
    %58 = vector.broadcast %57 : vector<2x4x8x1xf32> to vector<2x4x8x8xf32>
    %59 = arith.subf %55, %58 : vector<2x4x8x8xf32>
    %60 = math.exp %59 : vector<2x4x8x8xf32>
    %cst_25 = arith.constant dense<0.000000e+00> : vector<2x4x8xf32>
    %61 = vector.multi_reduction <add>, %60, %cst_25 [3] : vector<2x4x8x8xf32> to vector<2x4x8xf32>
    %62 = vector.shape_cast %61 : vector<2x4x8xf32> to vector<2x4x8x1xf32>
    %63 = tpu.reciprocal %62 : vector<2x4x8x1xf32> -> vector<2x4x8x1xf32>
    %64 = vector.broadcast %63 : vector<2x4x8x1xf32> to vector<2x4x8x8xf32>
    %65 = arith.mulf %60, %64 : vector<2x4x8x8xf32>
    %66 = vector.shape_cast %65 : vector<2x4x8x8xf32> to vector<8x8x8xf32>
    "tpu.trace_start"() <{level = 10 : i32, message = "bqk,bkd->bqd"}> : () -> ()
    %cst_26 = arith.constant dense<0.000000e+00> : vector<8x8x8xf32>
    %67 = tpu.matmul %66, %49, %cst_26 {dimension_numbers = #tpu.dot_dimension_numbers<[2], [1], [1], [2], [0, 0, 0, 1, 1, 2], [0], [0]>} : vector<8x8x8xf32>, vector<8x8x8xf32>, vector<8x8x8xf32> -> vector<8x8x8xf32>
    "tpu.trace_stop"() : () -> ()
    %68 = vector.shape_cast %67 : vector<8x8x8xf32> to vector<2x4x8x8xf32>
    %69 = tpu.transpose %68, [0, 2, 1, 3] : vector<2x4x8x8xf32> -> vector<2x8x4x8xf32>
    %70 = vector.shape_cast %69 : vector<2x8x4x8xf32> to vector<16x32xf32>
    %c0_27 = arith.constant 0 : index
    %c0_28 = arith.constant 0 : index
    %c0_29 = arith.constant 0 : index
    %71 = vector.load %arg8[%c0_27, %c0_28, %c0_29] : memref<1x32x32xf32, #tpu.memory_space<vmem>>, vector<1x32x32xf32>
    %72 = vector.shape_cast %71 : vector<1x32x32xf32> to vector<32x32xf32>
    %cst_30 = arith.constant dense<0.000000e+00> : vector<16x32xf32>
    %73 = tpu.matmul %70, %72, %cst_30 {dimension_numbers = #tpu.dot_dimension_numbers<[1], [0], [0], [1], [0, 0, 1, 1], [], []>} : vector<16x32xf32>, vector<32x32xf32>, vector<16x32xf32> -> vector<16x32xf32>
    %c0_31 = arith.constant 0 : index
    %c0_32 = arith.constant 0 : index
    %c0_33 = arith.constant 0 : index
    %74 = vector.load %arg9[%c0_31, %c0_32, %c0_33] : memref<1x1x32xf32, #tpu.memory_space<vmem>>, vector<1x1x32xf32>
    %75 = vector.shape_cast %74 : vector<1x1x32xf32> to vector<1x32xf32>
    %76 = vector.broadcast %75 : vector<1x32xf32> to vector<16x32xf32>
    %77 = arith.addf %73, %76 : vector<16x32xf32>
    %78 = arith.addf %4, %77 : vector<16x32xf32>
    %cst_34 = arith.constant dense<0.000000e+00> : vector<16xf32>
    %79 = vector.multi_reduction <add>, %78, %cst_34 [1] : vector<16x32xf32> to vector<16xf32>
    %80 = vector.shape_cast %79 : vector<16xf32> to vector<16x1xf32>
    %cst_35 = arith.constant 3.200000e+01 : f32
    %81 = vector.broadcast %cst_35 : f32 to vector<16x1xf32>
    %82 = arith.divf %80, %81 : vector<16x1xf32>
    %83 = vector.broadcast %82 : vector<16x1xf32> to vector<16x32xf32>
    %84 = arith.subf %78, %83 : vector<16x32xf32>
    %85 = arith.mulf %84, %84 : vector<16x32xf32>
    %cst_36 = arith.constant dense<0.000000e+00> : vector<16xf32>
    %86 = vector.multi_reduction <add>, %85, %cst_36 [1] : vector<16x32xf32> to vector<16xf32>
    %87 = vector.shape_cast %86 : vector<16xf32> to vector<16x1xf32>
    %cst_37 = arith.constant 3.200000e+01 : f32
    %88 = vector.broadcast %cst_37 : f32 to vector<16x1xf32>
    %89 = arith.divf %87, %88 : vector<16x1xf32>
    %90 = vector.broadcast %82 : vector<16x1xf32> to vector<16x32xf32>
    %91 = arith.subf %78, %90 : vector<16x32xf32>
    %cst_38 = arith.constant 9.99999974E-6 : f32
    %92 = vector.broadcast %cst_38 : f32 to vector<16x1xf32>
    %93 = arith.addf %89, %92 : vector<16x1xf32>
    %94 = math.rsqrt %93 : vector<16x1xf32>
    %95 = vector.broadcast %94 : vector<16x1xf32> to vector<16x32xf32>
    %96 = arith.mulf %91, %95 : vector<16x32xf32>
    %c0_39 = arith.constant 0 : index
    %c0_40 = arith.constant 0 : index
    %c0_41 = arith.constant 0 : index
    %97 = vector.load %arg10[%c0_39, %c0_40, %c0_41] : memref<1x1x32xf32, #tpu.memory_space<vmem>>, vector<1x1x32xf32>
    %98 = vector.shape_cast %97 : vector<1x1x32xf32> to vector<1x32xf32>
    %99 = vector.broadcast %98 : vector<1x32xf32> to vector<16x32xf32>
    %100 = arith.mulf %96, %99 : vector<16x32xf32>
    %c0_42 = arith.constant 0 : index
    %c0_43 = arith.constant 0 : index
    %c0_44 = arith.constant 0 : index
    %101 = vector.load %arg11[%c0_42, %c0_43, %c0_44] : memref<1x1x32xf32, #tpu.memory_space<vmem>>, vector<1x1x32xf32>
    %102 = vector.shape_cast %101 : vector<1x1x32xf32> to vector<1x32xf32>
    %103 = vector.broadcast %102 : vector<1x32xf32> to vector<16x32xf32>
    %104 = arith.addf %100, %103 : vector<16x32xf32>
    %c0_45 = arith.constant 0 : index
    %c0_46 = arith.constant 0 : index
    %c0_47 = arith.constant 0 : index
    %105 = vector.load %arg12[%c0_45, %c0_46, %c0_47] : memref<1x32x128xf32, #tpu.memory_space<vmem>>, vector<1x32x128xf32>
    %106 = vector.shape_cast %105 : vector<1x32x128xf32> to vector<32x128xf32>
    %cst_48 = arith.constant dense<0.000000e+00> : vector<16x128xf32>
    %107 = tpu.matmul %104, %106, %cst_48 {dimension_numbers = #tpu.dot_dimension_numbers<[1], [0], [0], [1], [0, 0, 1, 1], [], []>} : vector<16x32xf32>, vector<32x128xf32>, vector<16x128xf32> -> vector<16x128xf32>
    %c0_49 = arith.constant 0 : index
    %c0_50 = arith.constant 0 : index
    %c0_51 = arith.constant 0 : index
    %108 = vector.load %arg13[%c0_49, %c0_50, %c0_51] : memref<1x1x128xf32, #tpu.memory_space<vmem>>, vector<1x1x128xf32>
    %109 = vector.shape_cast %108 : vector<1x1x128xf32> to vector<1x128xf32>
    %110 = vector.broadcast %109 : vector<1x128xf32> to vector<16x128xf32>
    %111 = arith.addf %107, %110 : vector<16x128xf32>
    %cst_52 = arith.constant 1.702000e+00 : f32
    %112 = vector.broadcast %cst_52 : f32 to vector<16x128xf32>
    %113 = arith.mulf %112, %111 : vector<16x128xf32>
    %114 = arith.negf %113 : vector<16x128xf32>
    %115 = math.exp %114 : vector<16x128xf32>
    %cst_53 = arith.constant 1.000000e+00 : f32
    %116 = vector.broadcast %cst_53 : f32 to vector<16x128xf32>
    %117 = arith.addf %116, %115 : vector<16x128xf32>
    %118 = arith.divf %116, %117 : vector<16x128xf32>
    %119 = arith.mulf %111, %118 : vector<16x128xf32>
    %c0_54 = arith.constant 0 : index
    %c0_55 = arith.constant 0 : index
    %c0_56 = arith.constant 0 : index
    %120 = vector.load %arg14[%c0_54, %c0_55, %c0_56] : memref<1x128x32xf32, #tpu.memory_space<vmem>>, vector<1x128x32xf32>
    %121 = vector.shape_cast %120 : vector<1x128x32xf32> to vector<128x32xf32>
    %cst_57 = arith.constant dense<0.000000e+00> : vector<16x32xf32>
    %122 = tpu.matmul %119, %121, %cst_57 {dimension_numbers = #tpu.dot_dimension_numbers<[1], [0], [0], [1], [0, 0, 1, 1], [], []>} : vector<16x128xf32>, vector<128x32xf32>, vector<16x32xf32> -> vector<16x32xf32>
    %c0_58 = arith.constant 0 : index
    %c0_59 = arith.constant 0 : index
    %c0_60 = arith.constant 0 : index
    %123 = vector.load %arg15[%c0_58, %c0_59, %c0_60] : memref<1x1x32xf32, #tpu.memory_space<vmem>>, vector<1x1x32xf32>
    %124 = vector.shape_cast %123 : vector<1x1x32xf32> to vector<1x32xf32>
    %125 = vector.broadcast %124 : vector<1x32xf32> to vector<16x32xf32>
    %126 = arith.addf %122, %125 : vector<16x32xf32>
    %127 = arith.addf %78, %126 : vector<16x32xf32>
    %128 = vector.shape_cast %127 : vector<16x32xf32> to vector<2x8x32xf32>
    %c0_61 = arith.constant 0 : index
    %c0_62 = arith.constant 0 : index
    %c0_63 = arith.constant 0 : index
    %129 = vector.load %arg17[%c0_61, %c0_62, %c0_63] : memref<2x8x32xf32, #tpu.memory_space<vmem>>, vector<2x8x32xf32>
    tpu.vector_store %arg17[%c0_61, %c0_62, %c0_63], %128 {strides = array<i32>} : memref<2x8x32xf32, #tpu.memory_space<vmem>>, vector<2x8x32xf32>,
    %c1_i32 = arith.constant 1 : i32
    %130 = arith.cmpi eq, %arg1, %c1_i32 : i32
    %131 = arith.extui %130 : i1 to i32
    %c0_i32_64 = arith.constant 0 : i32
    %132 = arith.cmpi ne, %131, %c0_i32_64 : i32
    scf.if %132 {
      %133 = vector.shape_cast %127 : vector<16x32xf32> to vector<2x8x32xf32>
      %c0_65 = arith.constant 0 : index
      %c0_66 = arith.constant 0 : index
      %c0_67 = arith.constant 0 : index
      %134 = vector.load %arg16[%c0_65, %c0_66, %c0_67] : memref<2x8x32xf32, #tpu.memory_space<vmem>>, vector<2x8x32xf32>
      tpu.vector_store %arg16[%c0_65, %c0_66, %c0_67], %133 {strides = array<i32>} : memref<2x8x32xf32, #tpu.memory_space<vmem>>, vector<2x8x32xf32>,
    } else {
    }
    return
  }
  func.func @transform_0(%arg0: i32, %arg1: i32) -> (i32, i32, i32) {
    %c0_i32 = arith.constant 0 : i32
    %c0_i32_0 = arith.constant 0 : i32
    %c0_i32_1 = arith.constant 0 : i32
    return %arg0, %c0_i32, %c0_i32_0 : i32, i32, i32
  }
  func.func @transform_1(%arg0: i32, %arg1: i32) -> (i32, i32, i32) {
    %c0_i32 = arith.constant 0 : i32
    %c0_i32_0 = arith.constant 0 : i32
    %c0_i32_1 = arith.constant 0 : i32
    return %arg0, %c0_i32, %c0_i32_0 : i32, i32, i32
  }
  func.func @transform_2(%arg0: i32, %arg1: i32) -> (i32, i32, i32) {
    %c0_i32 = arith.constant 0 : i32
    %c0_i32_0 = arith.constant 0 : i32
    %c0_i32_1 = arith.constant 0 : i32
    return %arg1, %c0_i32, %c0_i32_0 : i32, i32, i32
  }
  func.func @transform_3(%arg0: i32, %arg1: i32) -> (i32, i32, i32) {
    %c0_i32 = arith.constant 0 : i32
    %c0_i32_0 = arith.constant 0 : i32
    %c0_i32_1 = arith.constant 0 : i32
    return %arg1, %c0_i32, %c0_i32_0 : i32, i32, i32
  }
  func.func @transform_4(%arg0: i32, %arg1: i32) -> (i32, i32, i32) {
    %c0_i32 = arith.constant 0 : i32
    %c0_i32_0 = arith.constant 0 : i32
    %c0_i32_1 = arith.constant 0 : i32
    return %arg1, %c0_i32, %c0_i32_0 : i32, i32, i32
  }
  func.func @transform_5(%arg0: i32, %arg1: i32) -> (i32, i32, i32) {
    %c0_i32 = arith.constant 0 : i32
    %c0_i32_0 = arith.constant 0 : i32
    %c0_i32_1 = arith.constant 0 : i32
    return %arg1, %c0_i32, %c0_i32_0 : i32, i32, i32
  }
  func.func @transform_6(%arg0: i32, %arg1: i32) -> (i32, i32, i32) {
    %c0_i32 = arith.constant 0 : i32
    %c0_i32_0 = arith.constant 0 : i32
    %c0_i32_1 = arith.constant 0 : i32
    return %arg1, %c0_i32, %c0_i32_0 : i32, i32, i32
  }
  func.func @transform_7(%arg0: i32, %arg1: i32) -> (i32, i32, i32) {
    %c0_i32 = arith.constant 0 : i32
    %c0_i32_0 = arith.constant 0 : i32
    %c0_i32_1 = arith.constant 0 : i32
    return %arg1, %c0_i32, %c0_i32_0 : i32, i32, i32
  }
  func.func @transform_8(%arg0: i32, %arg1: i32) -> (i32, i32, i32) {
    %c0_i32 = arith.constant 0 : i32
    %c0_i32_0 = arith.constant 0 : i32
    %c0_i32_1 = arith.constant 0 : i32
    return %arg1, %c0_i32, %c0_i32_0 : i32, i32, i32
  }
  func.func @transform_9(%arg0: i32, %arg1: i32) -> (i32, i32, i32) {
    %c0_i32 = arith.constant 0 : i32
    %c0_i32_0 = arith.constant 0 : i32
    %c0_i32_1 = arith.constant 0 : i32
    return %arg1, %c0_i32, %c0_i32_0 : i32, i32, i32
  }
  func.func @transform_10(%arg0: i32, %arg1: i32) -> (i32, i32, i32) {
    %c0_i32 = arith.constant 0 : i32
    %c0_i32_0 = arith.constant 0 : i32
    %c0_i32_1 = arith.constant 0 : i32
    return %arg1, %c0_i32, %c0_i32_0 : i32, i32, i32
  }
  func.func @transform_11(%arg0: i32, %arg1: i32) -> (i32, i32, i32) {
    %c0_i32 = arith.constant 0 : i32
    %c0_i32_0 = arith.constant 0 : i32
    %c0_i32_1 = arith.constant 0 : i32
    return %arg1, %c0_i32, %c0_i32_0 : i32, i32, i32
  }
  func.func @transform_12(%arg0: i32, %arg1: i32) -> (i32, i32, i32) {
    %c0_i32 = arith.constant 0 : i32
    %c0_i32_0 = arith.constant 0 : i32
    %c0_i32_1 = arith.constant 0 : i32
    return %arg1, %c0_i32, %c0_i32_0 : i32, i32, i32
  }
  func.func @transform_13(%arg0: i32, %arg1: i32) -> (i32, i32, i32) {
    %c0_i32 = arith.constant 0 : i32
    %c0_i32_0 = arith.constant 0 : i32
    %c0_i32_1 = arith.constant 0 : i32
    return %arg1, %c0_i32, %c0_i32_0 : i32, i32, i32
  }
  func.func @transform_14(%arg0: i32, %arg1: i32) -> (i32, i32, i32) {
    %c0_i32 = arith.constant 0 : i32
    %c0_i32_0 = arith.constant 0 : i32
    %c0_i32_1 = arith.constant 0 : i32
    return %arg0, %c0_i32, %c0_i32_0 : i32, i32, i32
  }
}

</mosaic_0001>

<bundles_post_ra>
// kernel: tpu_custom_call.1
= control target key start
LH: loop header
LB: loop body
LE: loop exit
PB: predicated region body
PF: predicated region fallthrough
CT: control target
= control target key end

     0   :  { %s3846_s0 = inlined_call_operand.vmem [shape: f32[2,8,32], index: 0, kind: input, shape index: {}]   ;;  %s3847_s1 = inlined_call_operand.vmem [shape: f32[2,1,8], index: 1, kind: input, shape index: {}]   ;;  %s3848_s2 = inlined_call_operand.vmem [shape: f32[2,1,32], index: 2, kind: input, shape index: {}]   ;;  %s3849_s3 = inlined_call_operand.vmem [shape: f32[2,1,32], index: 3, kind: input, shape index: {}]   ;;  %s3850_s4 = inlined_call_operand.vmem [shape: f32[2,32,96], index: 4, kind: input, shape index: {}]   ;;  %s3851_s5 = inlined_call_operand.vmem [shape: f32[2,1,96], index: 5, kind: input, shape index: {}]   ;;  %s3852_s6 = inlined_call_operand.vmem [shape: f32[2,32,32], index: 6, kind: input, shape index: {}]   ;;  %s3853_s7 = inlined_call_operand.vmem [shape: f32[2,1,32], index: 7, kind: input, shape index: {}]   ;;  %s3854_s8 = inlined_call_operand.vmem [shape: f32[2,1,32], index: 8, kind: input, shape index: {}]   ;;  %s3855_s9 = inlined_call_operand.vmem [shape: f32[2,1,32], index: 9, kind: input, shape index: {}]   ;;  %s3856_s10 = inlined_call_operand.vmem [shape: f32[2,32,128], index: 10, kind: input, shape index: {}]   ;;  %s3857_s11 = inlined_call_operand.vmem [shape: f32[2,1,128], index: 11, kind: input, shape index: {}]   ;;  %s3858_s12 = inlined_call_operand.vmem [shape: f32[2,128,32], index: 12, kind: input, shape index: {}]   ;;  %s3859_s13 = inlined_call_operand.vmem [shape: f32[2,1,32], index: 13, kind: input, shape index: {}]   ;;  %s3860_s14 = inlined_call_operand.hbm [shape: f32[2,8,32], index: 14, kind: output, shape index: {}]  }
   0x1   :  { %3865 = sst [smem:[#allocation10_spill]] %s3847_s1 }
   0x2   :  { %3866 = sst [smem:[#allocation11_spill]] %s3850_s4 }
   0x3   :  { %3867 = sst [smem:[#allocation12_spill]] %s3852_s6 }
   0x4   :  { %3868 = sst [smem:[#allocation13_spill]] %s3860_s14 }
   0x5   :  { %19 = vsyncpa [#allocation4], 0  ;;  %s3130_s29 = smov 0   ;;  %s3132_s30 = smov 0  }
   0x6   :  { %s3134_s15 = smov 0  }
   0x7 LB: > { %3869 = sst [smem:[#allocation6_spill]] %s3036_s30  ;;  %s34_s17 = sadd.s32 1, %s3036_s30  ;;  %s3040_s15 = sphi %s3134_s15, %s25_s15   ;;  %s3036_s30 = sphi %s3132_s30, %s3887_s30   ;;  %s3032_s29 = sphi %s3130_s29, %s3886_s29  }
   0x8   : > { %3870 = sst [smem:[#allocation7_spill]] %s3040_s15  ;;  %p35_p0 = scmp.ge.s32.totalorder %s34_s17, 2 }
   0x9   : > { %p2810_p1 = scmp.ge.s32.totalorder %s3040_s15, 1  ;;  %p540_p2 = scmp.lt.s32.totalorder %s3040_s15, 3 }
   0xa   : > { %s3889_s17 = smov (%p35_p0, %s34_s17), 0 }
   0xb   : > { %3871 = sst [smem:[#allocation8_spill]] %s3889_s17  ;;  %p541_p3 = pnand %p2810_p1, %p540_p2 }
   0xd   : > { %544 = sbr.rel (%p541_p3) target bundleno = 2120 (0x848), region = 76 }
  0x12   : > { %p640_p4 = scmp.lt.s32.totalorder %s3032_s29, 1  ;;  %s3872_s4 = sld [smem:[#allocation11_spill]] }
  0x13   : > { %s3873_s6 = sld [smem:[#allocation12_spill]]  ;;  %p2819_p5 = scmp.ne.s32.totalorder %s3032_s29, 0 }
  0x14   : > { %s3153_s18 = scalar_select %p640_p4, %s3032_s29, 1 }
  0x16   : > { %s2857_s25 = sshll.u32 %s3153_s18, 5  ;;  %s664_s1 = scalar_lea.vmem %s3854_s8, %s3153_s18 }
  0x17   : > { %s667_s28 = scalar_lea.vmem %s3855_s9, %s3153_s18  ;;  %s683_s26 = scalar_lea.vmem %s3859_s13, %s3153_s18 }
  0x18   : > { %s3171_s16 = scalar_lea.vmem %s3872_s4, %s2857_s25  ;;  %s3193_s4 = scalar_lea.vmem %s3856_s10, %s2857_s25 }
  0x19   : > { %s3176_s14 = scalar_lea.vmem %s3873_s6, %s2857_s25  ;;  %s675_s6 = scalar_lea.vmem %s3857_s11, %s3153_s18 }
  0x1a   : > { %3874 = sst [smem:[#allocation9_spill]] %s3176_s14  ;;  %s2860_s14 = sshll.u32 %s3153_s18, 7 }
  0x1b   : > { %s3203_s22 = scalar_lea.vmem %s3858_s12, %s2860_s14  ;;  %688 = sbr.rel (%p2819_p5) target bundleno = 35 (0x23), region = 80 }
  0x20   : > { %v689_v0 = vld [vmem:[%s3846_s0] sm:$0xff]  ;;  %vm691_vm0 = vcmask 261120   ;;  %v690_v1 = vld [vmem:[%s3846_s0 + $0x8] sm:$0xff] }
  0x21   : > { %692 = vst.msk [vmem:[#allocation2] sm:$0xff] %vm691_vm0, %v689_v0 }
  0x22   : > { %693 = vst.msk [vmem:[#allocation2 + $0x8] sm:$0xff] %vm691_vm0, %v690_v1 }
  0x23 PF: > { %vm696_vm1 = vcmask 261120   ;;  %v3042_v6 = vmov 32.0   ;;  %v763_v23 = vld [vmem:[%s3171_s16 + $0x18] sm:$0xff]  ;;  %v762_v24 = vld [vmem:[%s3171_s16 + $0x10] sm:$0xff]  ;;  %v761_v25 = vld [vmem:[%s3171_s16 + $0x8] sm:$0xff]  ;;  %s3875_s30 = scalar_lea.vmem %s3848_s2, %s3153_s18  ;;  %s3876_s21 = scalar_lea.vmem %s3849_s3, %s3153_s18  ;;  %vm818_vm9 = vcmask 1047556  }
  0x24   : > { %2934 = vrcp.f32 %v3042_v6  ;;  %786 = vmatpush.msra.mxu0 %v763_v23  ;;  %v760_v26 = vld [vmem:[%s3171_s16] sm:$0xff]  ;;  %s3877_s27 = scalar_lea.vmem %s3851_s5, %s3153_s18  ;;  %s3043_s25 = smov 104   ;;  %v3047_v62 = vmov 1983009808   ;;  %v3048_v6 = vmov 1934713408  }
  0x25   : > { %v2924_v41 = vld [vmem:[%s3875_s30] ss:$0 sm:$0xff]  ;;  %s3044_s19 = smov 120   ;;  %s3045_s20 = smov 112   ;;  %v823_v63 = vunpack.c.l.s4 %v3047_v62  ;;  %vm1526_vm10 = vcmask 64512  }
  0x26   : > { %787 = vmatpush.msra.mxu0 %v762_v24  ;;  %v2925_v45 = vld [vmem:[%s3876_s21] ss:$0 sm:$0xff]  ;;  %s3046_s14 = smov 96   ;;  %s3049_s16 = smov 64  }
  0x27   : > { %v2926_v55 = vld [vmem:[%s3877_s27] ss:$0 sm:$0xff]  ;;  %s3878_s15 = sld [smem:[#allocation10_spill]]  ;;  %s3050_s27 = smov 16  }
  0x28   : > { %v694_v2 = vld [vmem:[#allocation2] sm:$0xff]  ;;  %788 = vmatpush.msra.mxu0 %v761_v25  ;;  %s3881_s30 = scalar_lea.vmem %s3853_s7, %s3153_s18  ;;  %p2852_p6 = scmp.ne.s32.totalorder %s3032_s29, 1 }
  0x29   : > { %v697_v3 = vsel %vm696_vm1, %v694_v2, 0.0  ;;  %v695_v4 = vld [vmem:[#allocation2 + $0x8] sm:$0xff] }
  0x2a   : > { %698 = vadd.xlane.f32.xlu0 %v697_v3  ;;  %v700_v5 = vsel %vm696_vm1, %v695_v4, 0.0  ;;  %v2935_v7 = vpop.eup %2934  ;;  %789 = vmatpush.msra.mxu0 %v760_v26  ;;  %v3270_v3 = vunpack.c.0.s8 %v823_v63 }
  0x2b   : > { %v704_v8 = vmul.f32 32.0, %v2935_v7  ;;  %vm708_vm2 = vweird.f32 %v2935_v7 }
  0x2d   : > { %v705_v9 = vsub.f32 1.0, %v704_v8  ;;  %s3879_s21 = smov %s3878_s15 }
  0x2f   : > { %v706_v10 = vmul.f32 %v2935_v7, %v705_v9 }
  0x31   : > { %v707_v11 = vadd.f32 %v2935_v7, %v706_v10 }
  0x32   : > { %701 = vadd.xlane.f32.xlu0 %v700_v5 }
  0x33   : > { %v3218_v12 = vsel %vm708_vm2, %v2935_v7, %v707_v11  ;;  %v847_v7 = vunpack.c.l.s4 %v3048_v6 }
  0x9d   : > { %v699_v13 = vpop.xlane.xlu0 %698 }
  0x9e   : > { %v710_v14 = vmul.f32 %v3218_v12, %v699_v13 }
  0xa0   : > { %v712_v15 = vsub.f32 %v694_v2, %v710_v14 }
  0xa2   : > { %v714_v16 = vmul.f32 %v712_v15, %v712_v15 }
  0xa4   : > { %v716_v17 = vsel %vm696_vm1, %v714_v16, 0.0 }
  0xa5   : > { %717 = vadd.xlane.f32.xlu1 %v716_v17  ;;  %v702_v18 = vpop.xlane.xlu0 %701  ;;  %v3286_v17 = vunpack.c.0.s8 %v847_v7 }
  0xa6   : > { %v711_v19 = vmul.f32 %v3218_v12, %v702_v18 }
  0xa8   : > { %v713_v20 = vsub.f32 %v695_v4, %v711_v19 }
  0xaa   : > { %v715_v21 = vmul.f32 %v713_v20, %v713_v20 }
  0xac   : > { %v719_v22 = vsel %vm696_vm1, %v715_v21, 0.0 }
  0xad   : > { %720 = vadd.xlane.f32.xlu1 %v719_v22 }
 0x118   : > { %v718_v27 = vpop.xlane.xlu1 %717 }
 0x119   : > { %v722_v28 = vmul.f32 %v718_v27, %v3218_v12 }
 0x11b   : > { %v724_v29 = vadd.f32 1e-05, %v722_v28 }
 0x11d   : > { %2936 = vrsqrt.f32 %v724_v29  ;;  %vm732_vm4 = vweird.f32 %v724_v29 }
 0x120   : > { %v721_v30 = vpop.xlane.xlu1 %720 }
 0x121   : > { %v723_v31 = vmul.f32 %v721_v30, %v3218_v12 }
 0x123   : > { %v2937_v32 = vpop.eup %2936  ;;  %v725_v33 = vadd.f32 1e-05, %v723_v31 }
 0x124   : > { %v727_v34 = vmul.f32 %v2937_v32, %v724_v29  ;;  %vm733_vm3 = vweird.f32 %v2937_v32 }
 0x125   : > { %2938 = vrsqrt.f32 %v725_v33  ;;  %vm734_vm5 = vmor %vm732_vm4, %vm733_vm3  ;;  %vm742_vm6 = vweird.f32 %v725_v33 }
 0x126   : > { %v728_v35 = vmul.f32 %v2937_v32, %v727_v34 }
 0x128   : > { %v729_v36 = vmul.f32 0.5, %v728_v35 }
 0x12a   : > { %v730_v37 = vsub.f32 1.5, %v729_v36 }
 0x12b   : > { %v2939_v38 = vpop.eup %2938 }
 0x12c   : > { %v731_v39 = vmul.f32 %v2937_v32, %v730_v37  ;;  %v737_v40 = vmul.f32 %v2939_v38, %v725_v33  ;;  %vm743_vm7 = vweird.f32 %v2939_v38 }
 0x12d   : > { %vm744_vm8 = vmor %vm742_vm6, %vm743_vm7 }
 0x12e   : > { %v735_v42 = vsel %vm734_vm5, %v2937_v32, %v731_v39  ;;  %v738_v43 = vmul.f32 %v2939_v38, %v737_v40 }
 0x12f   : > { %v746_v44 = vmul.f32 %v735_v42, %v712_v15 }
 0x130   : > { %v739_v46 = vmul.f32 0.5, %v738_v43 }
 0x131   : > { %v752_v47 = vmul.f32 %v2924_v41, %v746_v44 }
 0x132   : > { %v740_v48 = vsub.f32 1.5, %v739_v46 }
 0x133   : > { %v758_v49 = vadd.f32 %v2925_v45, %v752_v47 }
 0x134   : > { %v741_v50 = vmul.f32 %v2939_v38, %v740_v48 }
 0x135   : > { %2820 = vmatmul.msk.f32.vlgmr.msra.gmra.mxu0 %vm696_vm1, %v758_v49 }
 0x136   : > { %v745_v51 = vsel %vm744_vm8, %v2939_v38, %v741_v50 }
 0x137   : > { %v747_v52 = vmul.f32 %v745_v51, %v713_v20 }
 0x139   : > { %v753_v53 = vmul.f32 %v2924_v41, %v747_v52 }
 0x13b   : > { %v759_v54 = vadd.f32 %v2925_v45, %v753_v53 }
 0x13d   : > { %2821 = vmatmul.msk.f32.gmra.mxu0 %vm696_vm1, %v759_v54 }
 0x1b2   : > { %v791_v56 = vpop.f32.mrf.mxu0 }
 0x1b3   : > { %v3247_v57 = vadd.f32 %v2926_v55, %v791_v56 }
 0x1b5   : > { %811 = vrot.lane.b32.xlu0 %v3247_v57, %s3043_s25  ;;  %799 = vrot.lane.b32.xlu2 %v3247_v57, %s3044_s19  ;;  %v820_v2 = vrot.slane %v3247_v57, 4 }
 0x1ba   : > { %v794_v58 = vpop.f32.mrf.mxu0 }
 0x1bb   : > { %v3251_v59 = vadd.f32 %v2926_v55, %v794_v58 }
 0x1bd   : > { %805 = vrot.lane.b32.xlu2 %v3247_v57, %s3045_s20  ;;  %801 = vrot.lane.b32.xlu1 %v3251_v59, %s3044_s19  ;;  %v876_v13 = vrot.slane %v3251_v59, 4  ;;  %s3052_s19 = smov 8  }
 0x1c5   : > { %807 = vrot.lane.b32.xlu2 %v3251_v59, %s3045_s20  ;;  %s3880_s20 = sld [smem:[#allocation9_spill]] }
 0x1cd   : > { %813 = vrot.lane.b32.xlu2 %v3251_v59, %s3043_s25  ;;  %s3051_s25 = smov 24  }
 0x1d5   : > { %1038 = vrot.lane.b32.xlu2 %v3247_v57, %s3046_s14 }
 0x20f   : > { %v800_v60 = vpop.permute.xlu2 %799 }
 0x210   : > { %1042 = vrot.lane.b32.xlu0 %v800_v60, %s3046_s14  ;;  %v832_v9 = vrot.slane %v800_v60, 4  ;;  %v2904_v38 = vpack.i.bf16 %v800_v60, %v3247_v57 }
 0x217   : > { %v3260_v61 = vpop.permute.xlu2 %805 }
 0x218   : > { %1040 = vrot.lane.b32.xlu0 %v3251_v59, %s3046_s14  ;;  %1046 = vrot.lane.b32.xlu2 %v3260_v61, %s3046_s14  ;;  %v817_v0 = vrot.slane %v3260_v61, 4  ;;  %v821_v4 = vsel %vm818_vm9, %v3260_v61, %v820_v2 }
 0x219   : > { %v829_v8 = vperm.slane %v821_v4, %v3270_v3 }
 0x21a   : > { %v819_v5 = vsel %vm818_vm9, %v817_v0, %v3247_v57 }
 0x21b   : > { %v825_v10 = vperm.slane %v819_v5, %v3270_v3  ;;  %v856_v20 = vrot.slane %v829_v8, 4 }
 0x21d   : > { %v844_v23 = vrot.slane %v825_v10, 4 }
 0x21f   : > { %v3267_v1 = vpop.permute.xlu2 %807 }
 0x220   : > { %v874_v11 = vrot.slane %v3267_v1, 4  ;;  %v877_v16 = vsel %vm818_vm9, %v3267_v1, %v876_v13 }
 0x221   : > { %v885_v26 = vperm.slane %v877_v16, %v3270_v3 }
 0x222   : > { %v875_v24 = vsel %vm818_vm9, %v874_v11, %v3251_v59 }
 0x223   : > { %v881_v31 = vperm.slane %v875_v24, %v3270_v3  ;;  %v912_v39 = vrot.slane %v885_v26, 4 }
 0x225   : > { %v900_v47 = vrot.slane %v881_v31, 4 }
 0x227   : > { %v3280_v14 = vpop.permute.xlu2 %813  ;;  %v3282_v15 = vpop.permute.xlu0 %811 }
 0x228   : > { %v830_v18 = vrot.slane %v3282_v15, 4  ;;  %v833_v19 = vsel %vm818_vm9, %v3282_v15, %v832_v9  ;;  %1052 = vrot.lane.b32.xlu0 %v3280_v14, %s3046_s14  ;;  %1050 = vrot.lane.b32.xlu1 %v3282_v15, %s3046_s14  ;;  %v2919_v22 = vpack.i.bf16 %v3280_v14, %v3267_v1  ;;  %v886_v40 = vrot.slane %v3280_v14, 4 }
 0x229   : > { %v841_v21 = vperm.slane %v833_v19, %v3270_v3 }
 0x22a   : > { %v831_v25 = vsel %vm818_vm9, %v830_v18, %v800_v60 }
 0x22b   : > { %v837_v27 = vperm.slane %v831_v25, %v3270_v3  ;;  %v854_v28 = vrot.slane %v841_v21, 4  ;;  %v857_v29 = vsel %vm818_vm9, %v841_v21, %v856_v20 }
 0x22c   : > { %v865_v30 = vperm.slane %v857_v29, %v3286_v17 }
 0x22d   : > { %v842_v32 = vrot.slane %v837_v27, 4  ;;  %v845_v33 = vsel %vm818_vm9, %v837_v27, %v844_v23  ;;  %v855_v34 = vsel %vm818_vm9, %v854_v28, %v829_v8 }
 0x22e   : > { %v853_v35 = vperm.slane %v845_v33, %v3286_v17  ;;  %v861_v36 = vperm.slane %v855_v34, %v3286_v17  ;;  %v872_v37 = vrot.slane %v865_v30, 4 }
 0x22f   : > { %v843_v41 = vsel %vm818_vm9, %v842_v32, %v825_v10  ;;  %v3313_v42 = vpop.permute.xlu1 %801 }
 0x230   : > { %v849_v43 = vperm.slane %v843_v41, %v3286_v17  ;;  %v868_v44 = vrot.slane %v853_v35, 4  ;;  %v870_v45 = vrot.slane %v861_v36, 4  ;;  %v873_v46 = vsel %vm818_vm9, 0.0, %v872_v37  ;;  %2905 = vrot.lane.b32.xlu0 %v2904_v38, %s3049_s16  ;;  %1044 = vrot.lane.b32.xlu2 %v3313_v42, %s3046_s14 }
 0x231   : > { %v946_v48 = vrot.slane %v873_v46, 4  ;;  %v887_v49 = vsel %vm818_vm9, %v886_v40, %v3313_v42  ;;  %v888_v50 = vrot.slane %v3313_v42, 4  ;;  %1048 = vrot.lane.b32.xlu1 %v3267_v1, %s3046_s14  ;;  %v941_v58 = vsel %vm818_vm9, %v872_v37, %v861_v36 }
 0x232   : > { %v893_v51 = vperm.slane %v887_v49, %v3270_v3  ;;  %v866_v52 = vrot.slane %v849_v43, 4  ;;  %v869_v53 = vsel %vm818_vm9, 0.0, %v868_v44  ;;  %v871_v54 = vsel %vm818_vm9, 0.0, %v870_v45 }
 0x233   : > { %v889_v55 = vsel %vm818_vm9, %v3280_v14, %v888_v50  ;;  %v930_v56 = vsel %vm818_vm9, %v868_v44, %v849_v43  ;;  %v935_v57 = vrot.slane %v869_v53, 4  ;;  %v945_v6 = vperm.slane %v941_v58, %v3270_v3 }
 0x234   : > { %v897_v60 = vperm.slane %v889_v55, %v3270_v3  ;;  %v898_v62 = vrot.slane %v893_v51, 4  ;;  %v901_v63 = vsel %vm818_vm9, %v893_v51, %v900_v47  ;;  %v867_v0 = vsel %vm818_vm9, 0.0, %v866_v52 }
 0x235   : > { %v909_v2 = vperm.slane %v901_v63, %v3286_v17  ;;  %v934_v4 = vperm.slane %v930_v56, %v3270_v3  ;;  %v936_v5 = vsel %vm818_vm9, %v935_v57, %v867_v0  ;;  %v947_v18 = vsel %vm818_vm9, %v946_v48, %v871_v54 }
 0x236   : > { %v899_v7 = vsel %vm818_vm9, %v898_v62, %v881_v31  ;;  %v910_v8 = vrot.slane %v897_v60, 4  ;;  %v913_v9 = vsel %vm818_vm9, %v897_v60, %v912_v39  ;;  %v940_v10 = vperm.slane %v936_v5, %v3270_v3 }
 0x237   : > { %v905_v11 = vperm.slane %v899_v7, %v3286_v17  ;;  %v921_v13 = vperm.slane %v913_v9, %v3286_v17  ;;  %v924_v16 = vrot.slane %v909_v2, 4  ;;  %v951_v20 = vperm.slane %v947_v18, %v3270_v3 }
 0x238   : > { %v911_v19 = vsel %vm818_vm9, %v910_v8, %v885_v26  ;;  %v954_v21 = vrot.slane %v934_v4, 4  ;;  %v966_v23 = vrot.slane %v945_v6, 4  ;;  %v952_v32 = vrot.slane %v940_v10, 4 }
 0x239   : > { %v917_v24 = vperm.slane %v911_v19, %v3286_v17  ;;  %v922_v25 = vrot.slane %v905_v11, 4  ;;  %v925_v27 = vsel %vm818_vm9, 0.0, %v924_v16  ;;  %v928_v28 = vrot.slane %v921_v13, 4 }
 0x23a   : > { %v989_v29 = vrot.slane %v925_v27, 4  ;;  %v955_v30 = vsel %vm818_vm9, %v940_v10, %v954_v21  ;;  %v967_v31 = vsel %vm818_vm9, %v951_v20, %v966_v23  ;;  %v953_v37 = vsel %vm818_vm9, %v952_v32, %v934_v4  ;;  %v1039_v27 = vpop.permute.xlu2 %1038 }
 0x23b   : > { %v923_v33 = vsel %vm818_vm9, 0.0, %v922_v25  ;;  %v929_v26 = vsel %vm818_vm9, 0.0, %v928_v28  ;;  %v963_v34 = vperm.slane %v955_v30, %v3286_v17  ;;  %v975_v35 = vperm.slane %v967_v31, %v3286_v17 }
 0x23c   : > { %v1000_v36 = vrot.slane %v929_v26, 4  ;;  %v964_v38 = vrot.slane %v951_v20, 4  ;;  %v926_v39 = vrot.slane %v917_v24, 4  ;;  %v959_v43 = vperm.slane %v953_v37, %v3286_v17 }
 0x23d   : > { %v980_v40 = vrot.slane %v975_v35, 4  ;;  %v982_v41 = vrot.slane %v963_v34, 4  ;;  %v984_v44 = vsel %vm818_vm9, %v924_v16, %v905_v11  ;;  %v990_v48 = vsel %vm818_vm9, %v989_v29, %v923_v33 }
 0x23e   : > { %v965_v45 = vsel %vm818_vm9, %v964_v38, %v945_v6  ;;  %v927_v46 = vsel %vm818_vm9, 0.0, %v926_v39  ;;  %v988_v47 = vperm.slane %v984_v44, %v3270_v3  ;;  %v978_v51 = vrot.slane %v959_v43, 4 }
 0x23f   : > { %v3363_v49 = vsel %vm818_vm9, %v980_v40, %v963_v34  ;;  %v971_v50 = vperm.slane %v965_v45, %v3286_v17  ;;  %v994_v52 = vperm.slane %v990_v48, %v3270_v3  ;;  %v995_v53 = vsel %vm818_vm9, %v928_v28, %v917_v24 }
 0x240   : > { %v1001_v54 = vsel %vm818_vm9, %v1000_v36, %v927_v46  ;;  %v3370_v55 = vsel %vm818_vm9, %v975_v35, %v982_v41  ;;  %v1008_v56 = vrot.slane %v988_v47, 4  ;;  %v999_v60 = vperm.slane %v995_v53, %v3270_v3 }
 0x241   : > { %v976_v57 = vrot.slane %v971_v50, 4  ;;  %v3373_v58 = vsel %vm818_vm9, %v971_v50, %v978_v51  ;;  %v1005_v62 = vperm.slane %v1001_v54, %v3270_v3  ;;  %v1006_v63 = vrot.slane %v994_v52, 4 }
 0x242   : > { %v1009_v0 = vsel %vm818_vm9, %v994_v52, %v1008_v56  ;;  %v1020_v5 = vrot.slane %v999_v60, 4  ;;  %v1064_v32 = vrot.slane %v1039_v27, 4 }
 0x243   : > { %v3379_v2 = vsel %vm818_vm9, %v976_v57, %v959_v43  ;;  %v1018_v4 = vrot.slane %v1005_v62, 4  ;;  %v1017_v6 = vperm.slane %v1009_v0, %v3286_v17  ;;  %v1007_v7 = vsel %vm818_vm9, %v1006_v63, %v988_v47 }
 0x244   : > { %v1013_v8 = vperm.slane %v1007_v7, %v3286_v17  ;;  %v1021_v10 = vsel %vm818_vm9, %v1005_v62, %v1020_v5 }
 0x245   : > { %v1019_v9 = vsel %vm818_vm9, %v1018_v4, %v999_v60  ;;  %v1036_v11 = vrot.slane %v1017_v6, 4  ;;  %v1029_v16 = vperm.slane %v1021_v10, %v3286_v17 }
 0x246   : > { %v1025_v13 = vperm.slane %v1019_v9, %v3286_v17  ;;  %v1032_v18 = vrot.slane %v1013_v8, 4 }
 0x247   : > { %v1034_v20 = vrot.slane %v1029_v16, 4  ;;  %v3389_v21 = vsel %vm818_vm9, %v1029_v16, %v1036_v11 }
 0x248   : > { %v1030_v19 = vrot.slane %v1025_v13, 4  ;;  %v3392_v23 = vsel %vm818_vm9, %v1025_v13, %v1032_v18 }
 0x249   : > { %v3395_v24 = vsel %vm818_vm9, %v1034_v20, %v1017_v6 }
 0x24a   : > { %v3398_v25 = vsel %vm818_vm9, %v1030_v19, %v1013_v8 }
 0x272   : > { %v1047_v29 = vpop.permute.xlu2 %1046 }
 0x273   : > { %v1062_v30 = vrot.slane %v1047_v29, 4  ;;  %v1065_v33 = vsel %vm818_vm9, %v1047_v29, %v1064_v32 }
 0x274   : > { %v1073_v34 = vperm.slane %v1065_v33, %v3270_v3 }
 0x275   : > { %v1063_v26 = vsel %vm818_vm9, %v1062_v30, %v1039_v27 }
 0x276   : > { %v1069_v36 = vperm.slane %v1063_v26, %v3270_v3  ;;  %v1100_v45 = vrot.slane %v1073_v34, 4 }
 0x278   : > { %v1088_v47 = vrot.slane %v1069_v36, 4 }
 0x282   : > { %v1043_v28 = vpop.permute.xlu0 %1042 }
 0x283   : > { %v1076_v37 = vrot.slane %v1043_v28, 4 }
 0x28a   : > { %v1041_v31 = vpop.permute.xlu0 %1040  ;;  %v1045_v35 = vpop.permute.xlu2 %1044 }
 0x28b   : > { %v1132_v40 = vrot.slane %v1045_v35, 4  ;;  %v1120_v7 = vrot.slane %v1041_v31, 4 }
 0x29a   : > { %v1051_v38 = vpop.permute.xlu1 %1050  ;;  %v1053_v39 = vpop.permute.xlu0 %1052 }
 0x29b   : > { %v1074_v41 = vrot.slane %v1051_v38, 4  ;;  %v1077_v43 = vsel %vm818_vm9, %v1051_v38, %v1076_v37  ;;  %v1130_v44 = vrot.slane %v1053_v39, 4  ;;  %v1133_v50 = vsel %vm818_vm9, %v1053_v39, %v1132_v40 }
 0x29c   : > { %v1085_v46 = vperm.slane %v1077_v43, %v3270_v3  ;;  %v1141_v63 = vperm.slane %v1133_v50, %v3270_v3 }
 0x29d   : > { %v1075_v48 = vsel %vm818_vm9, %v1074_v41, %v1043_v28  ;;  %v1131_v54 = vsel %vm818_vm9, %v1130_v44, %v1045_v35 }
 0x29e   : > { %v1081_v51 = vperm.slane %v1075_v48, %v3270_v3  ;;  %v1098_v52 = vrot.slane %v1085_v46, 4  ;;  %v1101_v53 = vsel %vm818_vm9, %v1085_v46, %v1100_v45  ;;  %v1137_v6 = vperm.slane %v1131_v54, %v3270_v3 }
 0x29f   : > { %v1109_v56 = vperm.slane %v1101_v53, %v3286_v17  ;;  %v1154_v29 = vrot.slane %v1141_v63, 4 }
 0x2a0   : > { %v1086_v57 = vrot.slane %v1081_v51, 4  ;;  %v1089_v60 = vsel %vm818_vm9, %v1081_v51, %v1088_v47  ;;  %v1099_v62 = vsel %vm818_vm9, %v1098_v52, %v1073_v34  ;;  %v1142_v28 = vrot.slane %v1137_v6, 4 }
 0x2a1   : > { %v1097_v0 = vperm.slane %v1089_v60, %v3286_v17  ;;  %v1105_v4 = vperm.slane %v1099_v62, %v3286_v17  ;;  %v1116_v5 = vrot.slane %v1109_v56, 4 }
 0x2a2   : > { %v1087_v8 = vsel %vm818_vm9, %v1086_v57, %v1069_v36 }
 0x2a3   : > { %v1093_v9 = vperm.slane %v1087_v8, %v3286_v17  ;;  %v1112_v10 = vrot.slane %v1097_v0, 4  ;;  %v1117_v11 = vsel %vm818_vm9, 0.0, %v1116_v5  ;;  %v1049_v13 = vpop.permute.xlu1 %1048  ;;  %v1114_v16 = vrot.slane %v1105_v4, 4 }
 0x2a4   : > { %v1185_v18 = vsel %vm818_vm9, %v1116_v5, %v1105_v4  ;;  %v1118_v19 = vrot.slane %v1049_v13, 4  ;;  %v1121_v20 = vsel %vm818_vm9, %v1049_v13, %v1120_v7  ;;  %v1190_v26 = vrot.slane %v1117_v11, 4 }
 0x2a5   : > { %v1113_v27 = vsel %vm818_vm9, 0.0, %v1112_v10  ;;  %v1129_v30 = vperm.slane %v1121_v20, %v3270_v3  ;;  %v1189_v33 = vperm.slane %v1185_v18, %v3270_v3  ;;  %v1110_v38 = vrot.slane %v1093_v9, 4 }
 0x2a6   : > { %v1179_v32 = vrot.slane %v1113_v27, 4  ;;  %v1119_v34 = vsel %vm818_vm9, %v1118_v19, %v1041_v31  ;;  %v1115_v39 = vsel %vm818_vm9, 0.0, %v1114_v16  ;;  %v1174_v41 = vsel %vm818_vm9, %v1112_v10, %v1093_v9 }
 0x2a7   : > { %v1125_v35 = vperm.slane %v1119_v34, %v3270_v3  ;;  %v1155_v36 = vsel %vm818_vm9, %v1154_v29, %v1129_v30  ;;  %v1156_v37 = vrot.slane %v1129_v30, 4  ;;  %v1111_v46 = vsel %vm818_vm9, 0.0, %v1110_v38 }
 0x2a8   : > { %v1161_v40 = vperm.slane %v1155_v36, %v3286_v17  ;;  %v1178_v50 = vperm.slane %v1174_v41, %v3270_v3  ;;  %v1180_v52 = vsel %vm818_vm9, %v1179_v32, %v1111_v46  ;;  %v1191_v53 = vsel %vm818_vm9, %v1190_v26, %v1115_v39 }
 0x2a9   : > { %v1143_v43 = vsel %vm818_vm9, %v1142_v28, %v1125_v35  ;;  %v1144_v44 = vrot.slane %v1125_v35, 4  ;;  %v1157_v45 = vsel %vm818_vm9, %v1141_v63, %v1156_v37  ;;  %v1210_v54 = vrot.slane %v1189_v33, 4 }
 0x2aa   : > { %v1149_v31 = vperm.slane %v1143_v43, %v3286_v17  ;;  %v1165_v47 = vperm.slane %v1157_v45, %v3286_v17  ;;  %v1170_v48 = vrot.slane %v1161_v40, 4  ;;  %v1184_v62 = vperm.slane %v1180_v52, %v3270_v3 }
 0x2ab   : > { %v1145_v51 = vsel %vm818_vm9, %v1137_v6, %v1144_v44  ;;  %v1195_v63 = vperm.slane %v1191_v53, %v3270_v3  ;;  %v1198_v0 = vrot.slane %v1178_v50, 4 }
 0x2ac   : > { %v1153_v56 = vperm.slane %v1145_v51, %v3286_v17  ;;  %v1172_v57 = vrot.slane %v1165_v47, 4  ;;  %v1166_v60 = vrot.slane %v1149_v31, 4  ;;  %v1171_v5 = vsel %vm818_vm9, 0.0, %v1170_v48 }
 0x2ad   : > { %v1199_v10 = vsel %vm818_vm9, %v1184_v62, %v1198_v0  ;;  %v1211_v11 = vsel %vm818_vm9, %v1195_v63, %v1210_v54  ;;  %v1196_v19 = vrot.slane %v1184_v62, 4  ;;  %v1208_v29 = vrot.slane %v1195_v63, 4 }
 0x2ae   : > { %v1168_v4 = vrot.slane %v1153_v56, 4  ;;  %v1173_v6 = vsel %vm818_vm9, 0.0, %v1172_v57  ;;  %v1239_v7 = vsel %vm818_vm9, %v1172_v57, %v1161_v40  ;;  %v1207_v16 = vperm.slane %v1199_v10, %v3286_v17 }
 0x2af   : > { %v1243_v8 = vperm.slane %v1239_v7, %v3270_v3  ;;  %v1244_v9 = vrot.slane %v1173_v6, 4  ;;  %v1219_v18 = vperm.slane %v1211_v11, %v3286_v17  ;;  %v1167_v30 = vsel %vm818_vm9, 0.0, %v1166_v60 }
 0x2b0   : > { %v1169_v13 = vsel %vm818_vm9, 0.0, %v1168_v4  ;;  %v1197_v34 = vsel %vm818_vm9, %v1196_v19, %v1178_v50  ;;  %v1209_v36 = vsel %vm818_vm9, %v1208_v29, %v1189_v33  ;;  %v1228_v37 = vsel %vm818_vm9, %v1168_v4, %v1149_v31 }
 0x2b1   : > { %v1233_v20 = vrot.slane %v1169_v13, 4  ;;  %v1245_v27 = vsel %vm818_vm9, %v1244_v9, %v1171_v5  ;;  %v1264_v28 = vrot.slane %v1243_v8, 4  ;;  %v1224_v26 = vrot.slane %v1219_v18, 4 }
 0x2b2   : > { %v1249_v32 = vperm.slane %v1245_v27, %v3270_v3  ;;  %v1203_v35 = vperm.slane %v1197_v34, %v3286_v17  ;;  %v1215_v41 = vperm.slane %v1209_v36, %v3286_v17  ;;  %v1232_v44 = vperm.slane %v1228_v37, %v3270_v3 }
 0x2b3   : > { %v1234_v38 = vsel %vm818_vm9, %v1233_v20, %v1167_v30  ;;  %v1225_v40 = vsel %vm818_vm9, %v1224_v26, %v1207_v16  ;;  %v1226_v52 = vrot.slane %v1207_v16, 4 }
 0x2b4   : > { %v1262_v39 = vrot.slane %v1249_v32, 4  ;;  %2826 = vmatpush.xpose.msk.msra.mxu3 %vm1526_vm10, %v1225_v40  ;;  %v1222_v43 = vrot.slane %v1203_v35, 4  ;;  %v1238_v45 = vperm.slane %v1234_v38, %v3270_v3  ;;  %v1265_v46 = vsel %vm818_vm9, %v1249_v32, %v1264_v28 }
 0x2b5   : > { %v1220_v47 = vrot.slane %v1215_v41, 4  ;;  %v1252_v50 = vrot.slane %v1232_v44, 4  ;;  %v1273_v51 = vperm.slane %v1265_v46, %v3286_v17  ;;  %v2909_v40 = vpack.i.bf16 %v3282_v15, %v3260_v61 }
 0x2b6   : > { %v1263_v33 = vsel %vm818_vm9, %v1262_v39, %v1243_v8  ;;  %v1223_v31 = vsel %vm818_vm9, %v1215_v41, %v1222_v43  ;;  %v1250_v48 = vrot.slane %v1238_v45, 4  ;;  %v2914_v41 = vpack.i.bf16 %v3313_v42, %v3251_v59  ;;  %v2906_v43 = vpop.permute.xlu0 %2905 }
 0x2b7   : > { %v1221_v53 = vsel %vm818_vm9, %v1220_v47, %v1203_v35  ;;  %2827 = vmatmul.msk.f32.vlgmr.msra.gmra.mxu3 %vm1526_vm10, %v3363_v49  ;;  %v1253_v56 = vsel %vm818_vm9, %v1238_v45, %v1252_v50  ;;  %v1269_v60 = vperm.slane %v1263_v33, %v3286_v17  ;;  %v1278_v63 = vrot.slane %v1273_v51, 4 }
 0x2b8   : > { %2822 = vmatpush.xpose.msk.msra.mxu2 %vm1526_vm10, %v1221_v53  ;;  %v1251_v54 = vsel %vm818_vm9, %v1250_v48, %v1232_v44  ;;  %v1261_v62 = vperm.slane %v1253_v56, %v3286_v17  ;;  %v1227_v49 = vsel %vm818_vm9, %v1219_v18, %v1226_v52 }
 0x2b9   : > { %v1257_v57 = vperm.slane %v1251_v54, %v3286_v17  ;;  %v1274_v4 = vrot.slane %v1269_v60, 4 }
 0x2ba   : > { %v1279_v6 = vsel %vm818_vm9, %v1278_v63, %v1261_v62  ;;  %v2907_v63 = vunpack.i.l.bf16 %v2906_v43 }
 0x2bb   : > { %2823 = vmatmul.msk.f32.vlgmr.msra.gmra.mxu2 %vm1526_vm10, %v3379_v2  ;;  %v1276_v0 = vrot.slane %v1257_v57, 4  ;;  %v1275_v7 = vsel %vm818_vm9, %v1274_v4, %v1257_v57  ;;  %v1280_v2 = vrot.slane %v1261_v62, 4 }
 0x2bc   : > { %2824 = vmatpush.xpose.msk.msrb.mxu2 %vm1526_vm10, %v1223_v31 }
 0x2bd   : > { %v1277_v5 = vsel %vm818_vm9, %v1269_v60, %v1276_v0  ;;  %v1281_v8 = vsel %vm818_vm9, %v1273_v51, %v1280_v2  ;;  %v2908_v60 = vunpack.i.h.bf16 %v2906_v43 }
 0x2be   : > { %2832 = vmatpush.xpose.msk.msrb.mxu3 %vm1526_vm10, %v1277_v5  ;;  %v1308_v5 = vrot.slane %v2907_v63, 4 }
 0x2c0   : > { %2828 = vmatpush.xpose.msk.msra.mxu2 %vm1526_vm10, %v1227_v49  ;;  %v1320_v49 = vrot.slane %v2908_v60, 4 }
 0x2c1   : > { %2833 = vmatmul.msk.f32.vlgmr.msrb.gmra.mxu3 %vm1526_vm10, %v3392_v23 }
 0x2c2   : > { %2834 = vmatpush.xpose.msk.msra.mxu3 %vm1526_vm10, %v1279_v6 }
 0x2c3   : > { %2825 = vmatmul.msk.f32.vlgmr.msrb.gmra.mxu2 %vm1526_vm10, %v3373_v58  ;;  %v2927_v58 = vld [vmem:[%s3878_s15] ss:$0 sm:$0xff] }
 0x2c4   : > { %2830 = vmatpush.xpose.msk.msrb.mxu2 %vm1526_vm10, %v1275_v7 }
 0x2c9   : > { %2835 = vmatmul.msk.f32.vlgmr.msra.gmra.mxu3 %vm1526_vm10, %v3395_v24 }
 0x2cb   : > { %2829 = vmatmul.msk.f32.vlgmr.msra.gmra.mxu2 %vm1526_vm10, %v3370_v55 }
 0x2cc   : > { %2836 = vmatpush.xpose.msk.msra.mxu2 %vm1526_vm10, %v1281_v8 }
 0x2d3   : > { %2831 = vmatmul.msk.f32.vlgmr.msrb.gmra.mxu2 %vm1526_vm10, %v3398_v25  ;;  %v2928_v25 = vld [vmem:[%s3879_s21 + $0x1] ss:$0 sm:$0xff] }
 0x2db   : > { %2837 = vmatmul.msk.f32.vlgmr.msra.gmra.mxu2 %vm1526_vm10, %v3389_v21 }
 0x33a   : > { %v1602_v23 = vpop.f32.mrf.mxu3 }
 0x33b   : > { %v1745_v9 = vadd.f32 %v2927_v58, %v1602_v23 }
 0x33d   : > { %v1757_v24 = vsel %vm1526_vm10, %v1745_v9, -inf }
 0x33e   : > { %v1550_v10 = vpop.f32.mrf.mxu2  ;;  %1758 = vmax.xlane.f32.xlu0 %v1757_v24 }
 0x33f   : > { %v1743_v55 = vadd.f32 %v2927_v58, %v1550_v10 }
 0x341   : > { %v1751_v11 = vsel %vm1526_vm10, %v1743_v55, -inf }
 0x342   : > { %1752 = vmax.xlane.f32.xlu2 %v1751_v11 }
 0x344   : > { %v1680_v13 = vpop.f32.mrf.mxu3 }
 0x345   : > { %v3512_v21 = vadd.f32 %v2928_v25, %v1680_v13 }
 0x346   : > { %v1576_v16 = vpop.f32.mrf.mxu2 }
 0x347   : > { %v1744_v18 = vadd.f32 %v2927_v58, %v1576_v16  ;;  %v1766_v19 = vsel %vm1526_vm10, %v3512_v21, -inf }
 0x348   : > { %1767 = vmax.xlane.f32.xlu1 %v1766_v19 }
 0x349   : > { %v1754_v20 = vsel %vm1526_vm10, %v1744_v18, -inf }
 0x34a   : > { %1755 = vmax.xlane.f32.xlu2 %v1754_v20 }
 0x34c   : > { %v1706_v27 = vpop.f32.mrf.mxu3 }
 0x34d   : > { %v1749_v28 = vadd.f32 %v2928_v25, %v1706_v27 }
 0x34e   : > { %v1628_v29 = vpop.f32.mrf.mxu2 }
 0x34f   : > { %v1746_v30 = vadd.f32 %v2927_v58, %v1628_v29  ;;  %v1769_v32 = vsel %vm1526_vm10, %v1749_v28, -inf }
 0x351   : > { %v1760_v26 = vsel %vm1526_vm10, %v1746_v30, -inf }
 0x352   : > { %1761 = vmax.xlane.f32.xlu1 %v1760_v26  ;;  %1770 = vmax.xlane.f32.xlu2 %v1769_v32 }
 0x356   : > { %v1654_v34 = vpop.f32.mrf.mxu2 }
 0x357   : > { %v1747_v35 = vadd.f32 %v2928_v25, %v1654_v34 }
 0x359   : > { %v1763_v36 = vsel %vm1526_vm10, %v1747_v35, -inf }
 0x35a   : > { %1764 = vmax.xlane.f32.xlu1 %v1763_v36 }
 0x35e   : > { %v1732_v37 = vpop.f32.mrf.mxu2 }
 0x35f   : > { %v3520_v38 = vadd.f32 %v2928_v25, %v1732_v37 }
 0x361   : > { %v1772_v39 = vsel %vm1526_vm10, %v3520_v38, -inf }
 0x362   : > { %1773 = vmax.xlane.f32.xlu0 %v1772_v39 }
 0x36a   : > { %2910 = vrot.lane.b32.xlu2 %v2909_v40, %s3049_s16 }
 0x373   : > { %2920 = vrot.lane.b32.xlu1 %v2919_v22, %s3049_s16 }
 0x376   : > { %2915 = vrot.lane.b32.xlu0 %v2914_v41, %s3049_s16 }
 0x3b1   : > { %v1759_v44 = vpop.xlane.xlu0 %1758 }
 0x3b2   : > { %v1777_v45 = vsub.f32 %v1745_v9, %v1759_v44 }
 0x3b4   : > { %v1787_v46 = vmul.f32 1.442695, %v1777_v45 }
 0x3b5   : > { %v1753_v47 = vpop.xlane.xlu2 %1752 }
 0x3b6   : > { %2940 = vpow2.f32 %v1787_v46  ;;  %v1775_v33 = vsub.f32 %v1743_v55, %v1753_v47 }
 0x3b8   : > { %v1783_v61 = vmul.f32 1.442695, %v1775_v33 }
 0x3ba   : > { %2942 = vpow2.f32 %v1783_v61 }
 0x3bb   : > { %v3534_v15 = vpop.xlane.xlu1 %1767 }
 0x3bc   : > { %v3536_v31 = vpop.eup %2940  ;;  %v1780_v47 = vsub.f32 %v3512_v21, %v3534_v15 }
 0x3bd   : > { %v1756_v1 = vpop.xlane.xlu2 %1755  ;;  %v1805_v14 = vsel %vm1526_vm10, %v3536_v31, 0.0 }
 0x3be   : > { %v1776_v59 = vsub.f32 %v1744_v18, %v1756_v1  ;;  %1806 = vadd.xlane.f32.xlu2 %v1805_v14 }
 0x3c0   : > { %v3540_v22 = vpop.eup %2942  ;;  %v1785_v42 = vmul.f32 1.442695, %v1776_v59 }
 0x3c1   : > { %v1799_v48 = vsel %vm1526_vm10, %v3540_v22, 0.0 }
 0x3c2   : > { %2944 = vpow2.f32 %v1785_v42  ;;  %1800 = vadd.xlane.f32.xlu1 %v1799_v48 }
 0x3c5   : > { %v1762_v50 = vpop.xlane.xlu1 %1761  ;;  %v1771_v51 = vpop.xlane.xlu2 %1770 }
 0x3c6   : > { %v1778_v52 = vsub.f32 %v1746_v30, %v1762_v50  ;;  %v1781_v53 = vsub.f32 %v1749_v28, %v1771_v51 }
 0x3c8   : > { %v3544_v54 = vpop.eup %2944  ;;  %v1789_v56 = vmul.f32 1.442695, %v1778_v52  ;;  %v1795_v57 = vmul.f32 1.442695, %v1781_v53  ;;  %v1793_v52 = vmul.f32 1.442695, %v1780_v47 }
 0x3c9   : > { %v1802_v62 = vsel %vm1526_vm10, %v3544_v54, 0.0 }
 0x3ca   : > { %2946 = vpow2.f32 %v1789_v56  ;;  %1803 = vadd.xlane.f32.xlu0 %v1802_v62 }
 0x3cb   : > { %2948 = vpow2.f32 %v1795_v57 }
 0x3cd   : > { %v2911_v0 = vpop.permute.xlu2 %2910  ;;  %v1765_v4 = vpop.xlane.xlu1 %1764 }
 0x3ce   : > { %v2913_v6 = vunpack.i.h.bf16 %v2911_v0  ;;  %v2912_v7 = vunpack.i.l.bf16 %v2911_v0  ;;  %v1779_v2 = vsub.f32 %v1747_v35, %v1765_v4 }
 0x3d0   : > { %v3548_v8 = vpop.eup %2946  ;;  %v1318_v58 = vrot.slane %v2913_v6, 4  ;;  %v1306_v23 = vrot.slane %v2912_v7, 4  ;;  %v1309_v9 = vsel %vm818_vm9, %v2912_v7, %v1308_v5  ;;  %v1321_v24 = vsel %vm818_vm9, %v2913_v6, %v1320_v49 }
 0x3d1   : > { %v3552_v10 = vpop.eup %2948  ;;  %v1317_v55 = vperm.slane %v1309_v9, %v3270_v3  ;;  %v1329_v11 = vperm.slane %v1321_v24, %v3270_v3  ;;  %v1791_v25 = vmul.f32 1.442695, %v1779_v2  ;;  %v1808_v13 = vsel %vm1526_vm10, %v3548_v8, 0.0 }
 0x3d2   : > { %v1307_v16 = vsel %vm818_vm9, %v1306_v23, %v2907_v63  ;;  %v1319_v18 = vsel %vm818_vm9, %v1318_v58, %v2908_v60  ;;  %1809 = vadd.xlane.f32.xlu1 %v1808_v13  ;;  %v1817_v19 = vsel %vm1526_vm10, %v3552_v10, 0.0 }
 0x3d3   : > { %v1313_v20 = vperm.slane %v1307_v16, %v3270_v3  ;;  %v1325_v27 = vperm.slane %v1319_v18, %v3270_v3  ;;  %v1342_v28 = vrot.slane %v1329_v11, 4  ;;  %v1344_v29 = vrot.slane %v1317_v55, 4  ;;  %1818 = vadd.xlane.f32.xlu0 %v1817_v19 }
 0x3d4   : > { %2950 = vpow2.f32 %v1791_v25 }
 0x3d5   : > { %v1330_v30 = vrot.slane %v1325_v27, 4  ;;  %v1332_v32 = vrot.slane %v1313_v20, 4  ;;  %v1343_v26 = vsel %vm818_vm9, %v1342_v28, %v1317_v55  ;;  %v1345_v34 = vsel %vm818_vm9, %v1329_v11, %v1344_v29  ;;  %v1774_v35 = vpop.xlane.xlu0 %1773 }
 0x3d6   : > { %v1349_v36 = vperm.slane %v1343_v26, %v3286_v17  ;;  %v1353_v37 = vperm.slane %v1345_v34, %v3286_v17  ;;  %v1782_v39 = vsub.f32 %v3520_v38, %v1774_v35 }
 0x3d7   : > { %v1331_v40 = vsel %vm818_vm9, %v1330_v30, %v1313_v20  ;;  %v1333_v41 = vsel %vm818_vm9, %v1325_v27, %v1332_v32 }
 0x3d8   : > { %v1337_v43 = vperm.slane %v1331_v40, %v3286_v17  ;;  %v1341_v44 = vperm.slane %v1333_v41, %v3286_v17  ;;  %v1358_v45 = vrot.slane %v1349_v36, 4  ;;  %v1360_v46 = vrot.slane %v1353_v37, 4 }
 0x3d9   : > { %v1797_v33 = vmul.f32 1.442695, %v1782_v39 }
 0x3da   : > { %v3575_v61 = vpop.eup %2950  ;;  %v1356_v1 = vrot.slane %v1341_v44, 4  ;;  %v1361_v14 = vsel %vm818_vm9, 0.0, %v1360_v46  ;;  %v1354_v38 = vrot.slane %v1337_v43, 4  ;;  %v1429_v48 = vsel %vm818_vm9, %v1360_v46, %v1349_v36 }
 0x3db   : > { %v1434_v59 = vrot.slane %v1361_v14, 4  ;;  %2952 = vpow2.f32 %v1797_v33  ;;  %v1811_v42 = vsel %vm1526_vm10, %v3575_v61, 0.0  ;;  %v1359_v51 = vsel %vm818_vm9, 0.0, %v1358_v45 }
 0x3dc   : > { %1812 = vadd.xlane.f32.xlu1 %v1811_v42  ;;  %v1357_v50 = vsel %vm818_vm9, 0.0, %v1356_v1  ;;  %v1418_v21 = vsel %vm818_vm9, %v1356_v1, %v1337_v43  ;;  %v1433_v15 = vperm.slane %v1429_v48, %v3270_v3  ;;  %v1355_v60 = vsel %vm818_vm9, 0.0, %v1354_v38 }
 0x3dd   : > { %v1422_v53 = vperm.slane %v1418_v21, %v3270_v3  ;;  %v1423_v56 = vrot.slane %v1357_v50, 4  ;;  %v1435_v57 = vsel %vm818_vm9, %v1434_v59, %v1359_v51  ;;  %2954 = vpow2.f32 %v1793_v52 }
 0x3de   : > { %v1439_v62 = vperm.slane %v1435_v57, %v3270_v3  ;;  %v1454_v63 = vrot.slane %v1433_v15, 4 }
 0x3df   : > { %v1424_v49 = vsel %vm818_vm9, %v1423_v56, %v1355_v60  ;;  %v1442_v0 = vrot.slane %v1422_v53, 4 }
 0x3e0   : > { %v1428_v4 = vperm.slane %v1424_v49, %v3270_v3  ;;  %v1452_v5 = vrot.slane %v1439_v62, 4  ;;  %v1455_v6 = vsel %vm818_vm9, %v1439_v62, %v1454_v63 }
 0x3e1   : > { %v3592_v7 = vpop.eup %2952  ;;  %v1463_v2 = vperm.slane %v1455_v6, %v3286_v17 }
 0x3e2   : > { %v1820_v58 = vsel %vm1526_vm10, %v3592_v7, 0.0  ;;  %v1440_v23 = vrot.slane %v1428_v4, 4  ;;  %v1443_v9 = vsel %vm818_vm9, %v1428_v4, %v1442_v0  ;;  %v1453_v24 = vsel %vm818_vm9, %v1452_v5, %v1433_v15 }
 0x3e3   : > { %1821 = vadd.xlane.f32.xlu2 %v1820_v58  ;;  %v1451_v55 = vperm.slane %v1443_v9, %v3286_v17  ;;  %v1468_v11 = vrot.slane %v1463_v2, 4  ;;  %v1459_v25 = vperm.slane %v1453_v24, %v3286_v17  ;;  %v3604_v30 = vpop.eup %2954 }
 0x3e4   : > { %v1441_v13 = vsel %vm818_vm9, %v1440_v23, %v1422_v53  ;;  %v1814_v43 = vsel %vm1526_vm10, %v3604_v30, 0.0 }
 0x3e5   : > { %v2921_v16 = vpop.permute.xlu1 %2920  ;;  %v1469_v18 = vsel %vm818_vm9, %v1468_v11, %v1451_v55  ;;  %v1470_v19 = vrot.slane %v1451_v55, 4  ;;  %v1447_v20 = vperm.slane %v1441_v13, %v3286_v17  ;;  %v1464_v27 = vrot.slane %v1459_v25, 4 }
 0x3e6   : > { %v2923_v28 = vunpack.i.h.bf16 %v2921_v16  ;;  %v2922_v29 = vunpack.i.l.bf16 %v2921_v16  ;;  %2007 = vmatpush.msra.mxu1 %v1469_v18 }
 0x3e7   : > { %v1465_v32 = vsel %vm818_vm9, %v1464_v27, %v1447_v20  ;;  %v1471_v26 = vsel %vm818_vm9, %v1463_v2, %v1470_v19  ;;  %v1466_v34 = vrot.slane %v1447_v20, 4 }
 0x3e8   : > { %v2916_v35 = vpop.permute.xlu0 %2915  ;;  %v1374_v36 = vrot.slane %v2923_v28, 4  ;;  %v1362_v37 = vrot.slane %v2922_v29, 4  ;;  %1961 = vmatpush.msrb.mxu3 %v1465_v32  ;;  %2030 = vmatpush.msrb.mxu2 %v1471_v26 }
 0x3e9   : > { %v2918_v39 = vunpack.i.h.bf16 %v2916_v35  ;;  %v2917_v40 = vunpack.i.l.bf16 %v2916_v35  ;;  %v1467_v41 = vsel %vm818_vm9, %v1459_v25, %v1466_v34 }
 0x3ea   : > { %1984 = vmatpush.msrb.mxu0 %v1467_v41 }
 0x3eb   : > { %v1376_v44 = vrot.slane %v2918_v39, 4  ;;  %v1364_v45 = vrot.slane %v2917_v40, 4  ;;  %v1363_v46 = vsel %vm818_vm9, %v1362_v37, %v2917_v40  ;;  %v1375_v47 = vsel %vm818_vm9, %v1374_v36, %v2918_v39  ;;  %1815 = vadd.xlane.f32.xlu2 %v1814_v43 }
 0x3ec   : > { %v1369_v33 = vperm.slane %v1363_v46, %v3270_v3  ;;  %v1381_v1 = vperm.slane %v1375_v47, %v3270_v3 }
 0x3ed   : > { %v1365_v14 = vsel %vm818_vm9, %v2922_v29, %v1364_v45  ;;  %v1377_v38 = vsel %vm818_vm9, %v2923_v28, %v1376_v44 }
 0x3ee   : > { %v1373_v59 = vperm.slane %v1365_v14, %v3270_v3  ;;  %v1385_v42 = vperm.slane %v1377_v38, %v3270_v3  ;;  %v1386_v48 = vrot.slane %v1381_v1, 4  ;;  %v1388_v50 = vrot.slane %v1369_v33, 4 }
 0x3f0   : > { %v1387_v51 = vsel %vm818_vm9, %v1386_v48, %v1369_v33  ;;  %v1389_v21 = vsel %vm818_vm9, %v1381_v1, %v1388_v50  ;;  %v1398_v15 = vrot.slane %v1385_v42, 4  ;;  %v1400_v52 = vrot.slane %v1373_v59, 4 }
 0x3f1   : > { %v1393_v53 = vperm.slane %v1387_v51, %v3286_v17  ;;  %v1397_v56 = vperm.slane %v1389_v21, %v3286_v17 }
 0x3f2   : > { %v1399_v57 = vsel %vm818_vm9, %v1398_v15, %v1373_v59  ;;  %v1401_v60 = vsel %vm818_vm9, %v1385_v42, %v1400_v52 }
 0x3f3   : > { %v1405_v62 = vperm.slane %v1399_v57, %v3286_v17  ;;  %v1409_v63 = vperm.slane %v1401_v60, %v3286_v17  ;;  %v1412_v49 = vrot.slane %v1397_v56, 4  ;;  %v1410_v0 = vrot.slane %v1393_v53, 4 }
 0x3f5   : > { %v1414_v4 = vrot.slane %v1405_v62, 4  ;;  %v1416_v5 = vrot.slane %v1409_v63, 4  ;;  %v1413_v6 = vsel %vm818_vm9, 0.0, %v1412_v49  ;;  %v1472_v2 = vsel %vm818_vm9, %v1412_v49, %v1393_v53 }
 0x3f6   : > { %v1477_v58 = vrot.slane %v1413_v6, 4  ;;  %v1411_v9 = vsel %vm818_vm9, 0.0, %v1410_v0  ;;  %v1476_v24 = vperm.slane %v1472_v2, %v3270_v3 }
 0x3f7   : > { %v1417_v23 = vsel %vm818_vm9, 0.0, %v1416_v5  ;;  %v1483_v55 = vsel %vm818_vm9, %v1416_v5, %v1405_v62  ;;  %v1415_v16 = vsel %vm818_vm9, 0.0, %v1414_v4 }
 0x3f8   : > { %v1488_v11 = vrot.slane %v1417_v23, 4  ;;  %v1478_v25 = vsel %vm818_vm9, %v1477_v58, %v1411_v9  ;;  %v1487_v13 = vperm.slane %v1483_v55, %v3270_v3  ;;  %v1496_v19 = vrot.slane %v1476_v24, 4 }
 0x3f9   : > { %v1482_v18 = vperm.slane %v1478_v25, %v3270_v3 }
 0x3fa   : > { %v1489_v20 = vsel %vm818_vm9, %v1488_v11, %v1415_v16  ;;  %v1508_v27 = vrot.slane %v1487_v13, 4 }
 0x3fb   : > { %v1493_v28 = vperm.slane %v1489_v20, %v3270_v3  ;;  %v1494_v29 = vrot.slane %v1482_v18, 4  ;;  %v1497_v32 = vsel %vm818_vm9, %v1482_v18, %v1496_v19 }
 0x3fc   : > { %v1505_v26 = vperm.slane %v1497_v32, %v3286_v17 }
 0x3fd   : > { %v1506_v34 = vrot.slane %v1493_v28, 4  ;;  %v1509_v35 = vsel %vm818_vm9, %v1493_v28, %v1508_v27  ;;  %v1495_v36 = vsel %vm818_vm9, %v1494_v29, %v1476_v24 }
 0x3fe   : > { %v1517_v37 = vperm.slane %v1509_v35, %v3286_v17  ;;  %v1524_v39 = vrot.slane %v1505_v26, 4  ;;  %v1501_v40 = vperm.slane %v1495_v36, %v3286_v17 }
 0x3ff   : > { %v1507_v41 = vsel %vm818_vm9, %v1506_v34, %v1487_v13 }
 0x400   : > { %v1522_v43 = vrot.slane %v1517_v37, 4  ;;  %v1525_v44 = vsel %vm818_vm9, %v1517_v37, %v1524_v39  ;;  %v1513_v45 = vperm.slane %v1507_v41, %v3286_v17  ;;  %v1520_v46 = vrot.slane %v1501_v40, 4 }
 0x401   : > { %2122 = vmatpush.msra.mxu2 %v1525_v44 }
 0x402   : > { %v1523_v47 = vsel %vm818_vm9, %v1522_v43, %v1505_v26  ;;  %v1518_v33 = vrot.slane %v1513_v45, 4  ;;  %v1521_v1 = vsel %vm818_vm9, %v1513_v45, %v1520_v46 }
 0x403   : > { %2099 = vmatpush.msrb.mxu1 %v1523_v47  ;;  %2076 = vmatpush.msra.mxu0 %v1521_v1 }
 0x404   : > { %v1519_v14 = vsel %vm818_vm9, %v1518_v33, %v1501_v40 }
 0x405   : > { %2053 = vmatpush.msra.mxu3 %v1519_v14 }
 0x431   : > { %v1807_v38 = vpop.xlane.xlu2 %1806 }
 0x432   : > { %2956 = vrcp.f32 %v1807_v38  ;;  %v1862_v21 = vand.u32 2147483648, %v1807_v38  ;;  %v1860_v15 = vand.u32 2147483647, %v1807_v38  ;;  %vm1856_vm12 = vweird.f32 %v1807_v38 }
 0x434   : > { %v1863_v62 = vor.u32 1.1754944e-38, %v1862_v21  ;;  %vm1861_vm14 = vcmp.eq.f32.partialorder %v1860_v15, 8.507059e+37 }
 0x435   : > { %v1801_v59 = vpop.xlane.xlu1 %1800 }
 0x436   : > { %2958 = vrcp.f32 %v1801_v59  ;;  %v1834_v63 = vand.u32 2147483648, %v1801_v59  ;;  %v1832_v0 = vand.u32 2147483647, %v1801_v59  ;;  %vm1828_vm0 = vweird.f32 %v1801_v59 }
 0x438   : > { %v2957_v42 = vpop.eup %2956  ;;  %v1835_v23 = vor.u32 1.1754944e-38, %v1834_v63  ;;  %vm1833_vm3 = vcmp.eq.f32.partialorder %v1832_v0, 8.507059e+37 }
 0x439   : > { %v1852_v48 = vmul.f32 %v2957_v42, %v1807_v38  ;;  %vm1857_vm11 = vweird.f32 %v2957_v42 }
 0x43a   : > { %vm1858_vm13 = vmor %vm1856_vm12, %vm1857_vm11 }
 0x43b   : > { %v1853_v50 = vsub.f32 1.0, %v1852_v48 }
 0x43c   : > { %v2959_v51 = vpop.eup %2958 }
 0x43d   : > { %v1854_v52 = vmul.f32 %v2957_v42, %v1853_v50  ;;  %v1824_v53 = vmul.f32 %v2959_v51, %v1801_v59  ;;  %v1804_v56 = vpop.xlane.xlu0 %1803  ;;  %vm1829_vm15 = vweird.f32 %v2959_v51 }
 0x43e   : > { %2960 = vrcp.f32 %v1804_v56  ;;  %vm1830_vm2 = vmor %vm1828_vm0, %vm1829_vm15  ;;  %v1848_v16 = vand.u32 2147483648, %v1804_v56  ;;  %vm1842_vm5 = vweird.f32 %v1804_v56 }
 0x43f   : > { %v1825_v57 = vsub.f32 1.0, %v1824_v53  ;;  %v1855_v60 = vadd.f32 %v2957_v42, %v1854_v52 }
 0x440   : > { %v1849_v28 = vor.u32 1.1754944e-38, %v1848_v16 }
 0x441   : > { %v1826_v49 = vmul.f32 %v2959_v51, %v1825_v57  ;;  %v1859_v4 = vsel %vm1858_vm13, %v2957_v42, %v1855_v60 }
 0x442   : > { %v1864_v5 = vsel %vm1861_vm14, %v1863_v62, %v1859_v4 }
 0x443   : > { %v1827_v6 = vadd.f32 %v2959_v51, %v1826_v49  ;;  %v1937_v2 = vmul.f32 %v3536_v31, %v1864_v5  ;;  %v1846_v31 = vand.u32 2147483647, %v1804_v56 }
 0x444   : > { %v2961_v58 = vpop.eup %2960 }
 0x445   : > { %v1831_v9 = vsel %vm1830_vm2, %v2959_v51, %v1827_v6  ;;  %v1838_v24 = vmul.f32 %v2961_v58, %v1804_v56  ;;  %2840 = vmatmul.msk.f32.vlgmr.msra.gmra.mxu1 %vm1526_vm10, %v1937_v2  ;;  %v1810_v55 = vpop.xlane.xlu1 %1809  ;;  %vm1843_vm4 = vweird.f32 %v2961_v58  ;;  %vm1847_vm7 = vcmp.eq.f32.partialorder %v1846_v31, 8.507059e+37 }
 0x446   : > { %v1836_v11 = vsel %vm1833_vm3, %v1835_v23, %v1831_v9  ;;  %2962 = vrcp.f32 %v1810_v55  ;;  %v1819_v25 = vpop.xlane.xlu0 %1818  ;;  %vm1844_vm6 = vmor %vm1842_vm5, %vm1843_vm4  ;;  %v1876_v39 = vand.u32 2147483648, %v1810_v55  ;;  %v1874_v43 = vand.u32 2147483647, %v1810_v55 }
 0x447   : > { %v1839_v13 = vsub.f32 1.0, %v1838_v24  ;;  %2964 = vrcp.f32 %v1819_v25  ;;  %v1935_v18 = vmul.f32 %v3540_v22, %v1836_v11  ;;  %v1918_v45 = vand.u32 2147483648, %v1819_v25 }
 0x448   : > { %vm1870_vm12 = vweird.f32 %v1810_v55  ;;  %v1916_v47 = vand.u32 2147483647, %v1819_v25  ;;  %v1877_v33 = vor.u32 1.1754944e-38, %v1876_v39  ;;  %vm1912_vm14 = vweird.f32 %v1819_v25 }
 0x449   : > { %v1840_v19 = vmul.f32 %v2961_v58, %v1839_v13  ;;  %2838 = vmatmul.msk.f32.vlgmr.msrb.gmra.mxu3 %vm1526_vm10, %v1935_v18  ;;  %vm1875_vm15 = vcmp.eq.f32.partialorder %v1874_v43, 8.507059e+37  ;;  %v1919_v59 = vor.u32 1.1754944e-38, %v1918_v45 }
 0x44a   : > { %vm1917_vm2 = vcmp.eq.f32.partialorder %v1916_v47, 8.507059e+37 }
 0x44b   : > { %v1841_v20 = vadd.f32 %v2961_v58, %v1840_v19 }
 0x44c   : > { %v2963_v27 = vpop.eup %2962 }
 0x44d   : > { %v2965_v29 = vpop.eup %2964  ;;  %v1866_v32 = vmul.f32 %v2963_v27, %v1810_v55  ;;  %v1845_v26 = vsel %vm1844_vm6, %v2961_v58, %v1841_v20  ;;  %vm1871_vm8 = vweird.f32 %v2963_v27 }
 0x44e   : > { %v1908_v34 = vmul.f32 %v2965_v29, %v1819_v25  ;;  %v1850_v35 = vsel %vm1847_vm7, %v1849_v28, %v1845_v26  ;;  %vm1913_vm11 = vweird.f32 %v2965_v29  ;;  %vm1872_vm13 = vmor %vm1870_vm12, %vm1871_vm8 }
 0x44f   : > { %v1867_v36 = vsub.f32 1.0, %v1866_v32  ;;  %v1813_v37 = vpop.xlane.xlu1 %1812  ;;  %v1936_v22 = vmul.f32 %v3544_v54, %v1850_v35  ;;  %vm1914_vm0 = vmor %vm1912_vm14, %vm1913_vm11 }
 0x450   : > { %v1909_v40 = vsub.f32 1.0, %v1908_v34  ;;  %2966 = vrcp.f32 %v1813_v37  ;;  %v1890_v53 = vand.u32 2147483648, %v1813_v37  ;;  %v1888_v57 = vand.u32 2147483647, %v1813_v37 }
 0x451   : > { %v1868_v41 = vmul.f32 %v2963_v27, %v1867_v36  ;;  %2839 = vmatmul.msk.f32.vlgmr.msrb.gmra.mxu0 %vm1526_vm10, %v1936_v22  ;;  %vm1884_vm4 = vweird.f32 %v1813_v37 }
 0x452   : > { %v1910_v44 = vmul.f32 %v2965_v29, %v1909_v40  ;;  %v1891_v63 = vor.u32 1.1754944e-38, %v1890_v53  ;;  %vm1889_vm6 = vcmp.eq.f32.partialorder %v1888_v57, 8.507059e+37 }
 0x453   : > { %v1869_v46 = vadd.f32 %v2963_v27, %v1868_v41 }
 0x454   : > { %v1911_v1 = vadd.f32 %v2965_v29, %v1910_v44 }
 0x455   : > { %v1873_v14 = vsel %vm1872_vm13, %v2963_v27, %v1869_v46 }
 0x456   : > { %v2967_v54 = vpop.eup %2966  ;;  %v1878_v38 = vsel %vm1875_vm15, %v1877_v33, %v1873_v14  ;;  %v1822_v42 = vpop.xlane.xlu2 %1821  ;;  %v1915_v48 = vsel %vm1914_vm0, %v2965_v29, %v1911_v1 }
 0x457   : > { %v1880_v50 = vmul.f32 %v2967_v54, %v1813_v37  ;;  %2968 = vrcp.f32 %v1822_v42  ;;  %v1938_v51 = vmul.f32 %v3548_v8, %v1878_v38  ;;  %v1920_v21 = vsel %vm1917_vm2, %v1919_v59, %v1915_v48 }
 0x458   : > { %v1941_v52 = vmul.f32 %v3552_v10, %v1920_v21  ;;  %vm1885_vm3 = vweird.f32 %v2967_v54  ;;  %v1932_v5 = vand.u32 2147483648, %v1822_v42  ;;  %v1930_v58 = vand.u32 2147483647, %v1822_v42 }
 0x459   : > { %v1881_v15 = vsub.f32 1.0, %v1880_v50  ;;  %2841 = vmatmul.msk.f32.vlgmr.msrb.gmra.mxu2 %vm1526_vm10, %v1938_v51  ;;  %vm1886_vm5 = vmor %vm1884_vm4, %vm1885_vm3  ;;  %vm1926_vm8 = vweird.f32 %v1822_v42  ;;  %vm2373_vm2 = vcmask 130048   ;;  %vm2376_vm3 = vcmask 195584  }
 0x45a   : > { %2844 = vmatmul.msk.f32.vlgmr.msrb.gmra.mxu1 %vm1526_vm10, %v1941_v52  ;;  %v1933_v24 = vor.u32 1.1754944e-38, %v1932_v5  ;;  %vm1931_vm12 = vcmp.eq.f32.partialorder %v1930_v58, 8.507059e+37 }
 0x45b   : > { %v1882_v56 = vmul.f32 %v2967_v54, %v1881_v15 }
 0x45d   : > { %v2969_v60 = vpop.eup %2968  ;;  %v1883_v62 = vadd.f32 %v2967_v54, %v1882_v56 }
 0x45e   : > { %v1922_v49 = vmul.f32 %v2969_v60, %v1822_v42  ;;  %v1816_v0 = vpop.xlane.xlu2 %1815  ;;  %vm1927_vm7 = vweird.f32 %v2969_v60 }
 0x45f   : > { %v1887_v8 = vsel %vm1886_vm5, %v2967_v54, %v1883_v62  ;;  %2970 = vrcp.f32 %v1816_v0  ;;  %vm1928_vm11 = vmor %vm1926_vm8, %vm1927_vm7  ;;  %v1904_v18 = vand.u32 2147483648, %v1816_v0  ;;  %vm1898_vm14 = vweird.f32 %v1816_v0 }
 0x460   : > { %v1892_v4 = vsel %vm1889_vm6, %v1891_v63, %v1887_v8  ;;  %v1923_v10 = vsub.f32 1.0, %v1922_v49 }
 0x461   : > { %v1939_v6 = vmul.f32 %v3575_v61, %v1892_v4  ;;  %v1902_v61 = vand.u32 2147483647, %v1816_v0  ;;  %v1905_v20 = vor.u32 1.1754944e-38, %v1904_v18 }
 0x462   : > { %v1924_v2 = vmul.f32 %v2969_v60, %v1923_v10 }
 0x463   : > { %2842 = vmatmul.msk.f32.vlgmr.msra.gmra.mxu3 %vm1526_vm10, %v1939_v6  ;;  %vm1903_vm0 = vcmp.eq.f32.partialorder %v1902_v61, 8.507059e+37 }
 0x464   : > { %v1925_v23 = vadd.f32 %v2969_v60, %v1924_v2 }
 0x465   : > { %v2971_v9 = vpop.eup %2970 }
 0x466   : > { %v1929_v55 = vsel %vm1928_vm11, %v2969_v60, %v1925_v23  ;;  %v1894_v11 = vmul.f32 %v2971_v9, %v1816_v0  ;;  %vm1899_vm13 = vweird.f32 %v2971_v9 }
 0x467   : > { %v1934_v25 = vsel %vm1931_vm12, %v1933_v24, %v1929_v55  ;;  %vm1900_vm15 = vmor %vm1898_vm14, %vm1899_vm13 }
 0x468   : > { %v1895_v13 = vsub.f32 1.0, %v1894_v11  ;;  %v1942_v16 = vmul.f32 %v3592_v7, %v1934_v25 }
 0x46a   : > { %v1896_v19 = vmul.f32 %v2971_v9, %v1895_v13  ;;  %2845 = vmatmul.msk.f32.vlgmr.msra.gmra.mxu2 %vm1526_vm10, %v1942_v16 }
 0x46c   : > { %v1897_v31 = vadd.f32 %v2971_v9, %v1896_v19 }
 0x46e   : > { %v1901_v27 = vsel %vm1900_vm15, %v2971_v9, %v1897_v31 }
 0x46f   : > { %v1906_v28 = vsel %vm1903_vm0, %v1905_v20, %v1901_v27 }
 0x470   : > { %v1940_v29 = vmul.f32 %v3604_v30, %v1906_v28 }
 0x472   : > { %2843 = vmatmul.msk.f32.vlgmr.msra.gmra.mxu0 %vm1526_vm10, %v1940_v29 }
 0x4c2   : > { %v2009_v7 = vpop.f32.mrf.mxu1 }
 0x4c3   : > { %v2127_v34 = vrot.slane %v2009_v7, 4 }
 0x4cc   : > { %v1963_v32 = vpop.f32.mrf.mxu3 }
 0x4cd   : > { %v2129_v26 = vrot.slane %v1963_v32, 4  ;;  %v2128_v37 = vsel %vm818_vm9, %v2127_v34, %v1963_v32 }
 0x4ce   : > { %v1986_v36 = vpop.f32.mrf.mxu0  ;;  %v2134_v40 = vperm.slane %v2128_v37, %v3270_v3 }
 0x4cf   : > { %v2130_v35 = vsel %vm818_vm9, %v2009_v7, %v2129_v26  ;;  %v2141_v39 = vrot.slane %v1986_v36, 4 }
 0x4d0   : > { %v2138_v22 = vperm.slane %v2130_v35, %v3270_v3  ;;  %v2153_v47 = vrot.slane %v2134_v40, 4 }
 0x4d2   : > { %v2165_v44 = vrot.slane %v2138_v22, 4 }
 0x4d7   : > { %v2101_v54 = vpop.f32.mrf.mxu1 }
 0x4d8   : > { %v2183_v15 = vrot.slane %v2101_v54, 4 }
 0x4dc   : > { %v2032_v41 = vpop.f32.mrf.mxu2 }
 0x4dd   : > { %v2139_v43 = vrot.slane %v2032_v41, 4  ;;  %v2142_v30 = vsel %vm818_vm9, %v2032_v41, %v2141_v39 }
 0x4de   : > { %v2150_v45 = vperm.slane %v2142_v30, %v3270_v3 }
 0x4df   : > { %v2140_v46 = vsel %vm818_vm9, %v2139_v43, %v1986_v36 }
 0x4e0   : > { %v2146_v33 = vperm.slane %v2140_v46, %v3270_v3  ;;  %v2163_v1 = vrot.slane %v2150_v45, 4  ;;  %v2166_v14 = vsel %vm818_vm9, %v2150_v45, %v2165_v44 }
 0x4e1   : > { %v2174_v38 = vperm.slane %v2166_v14, %v3286_v17 }
 0x4e2   : > { %v2151_v59 = vrot.slane %v2146_v33, 4  ;;  %v2154_v42 = vsel %vm818_vm9, %v2146_v33, %v2153_v47  ;;  %v2164_v48 = vsel %vm818_vm9, %v2163_v1, %v2138_v22 }
 0x4e3   : > { %v2162_v50 = vperm.slane %v2154_v42, %v3286_v17  ;;  %v2170_v51 = vperm.slane %v2164_v48, %v3286_v17  ;;  %v2181_v21 = vrot.slane %v2174_v38, 4 }
 0x4e4   : > { %v2152_v52 = vsel %vm818_vm9, %v2151_v59, %v2134_v40 }
 0x4e5   : > { %v2158_v53 = vperm.slane %v2152_v52, %v3286_v17  ;;  %v2177_v56 = vrot.slane %v2162_v50, 4  ;;  %v2179_v57 = vrot.slane %v2170_v51, 4  ;;  %v2182_v60 = vsel %vm818_vm9, 0.0, %v2181_v21 }
 0x4e6   : > { %v2055_v62 = vpop.f32.mrf.mxu3  ;;  %v2250_v63 = vsel %vm818_vm9, %v2181_v21, %v2170_v51  ;;  %v2255_v49 = vrot.slane %v2182_v60, 4 }
 0x4e7   : > { %v2184_v0 = vsel %vm818_vm9, %v2183_v15, %v2055_v62  ;;  %v2185_v8 = vrot.slane %v2055_v62, 4  ;;  %v2175_v4 = vrot.slane %v2158_v53, 4  ;;  %v2178_v10 = vsel %vm818_vm9, 0.0, %v2177_v56 }
 0x4e8   : > { %v2180_v5 = vsel %vm818_vm9, 0.0, %v2179_v57  ;;  %v2254_v6 = vperm.slane %v2250_v63, %v3270_v3  ;;  %v2244_v2 = vrot.slane %v2178_v10, 4  ;;  %v2239_v58 = vsel %vm818_vm9, %v2177_v56, %v2158_v53 }
 0x4e9   : > { %v2186_v23 = vsel %vm818_vm9, %v2101_v54, %v2185_v8  ;;  %v2176_v9 = vsel %vm818_vm9, 0.0, %v2175_v4  ;;  %v2243_v24 = vperm.slane %v2239_v58, %v3270_v3  ;;  %v2256_v55 = vsel %vm818_vm9, %v2255_v49, %v2180_v5 }
 0x4ea   : > { %v2190_v11 = vperm.slane %v2184_v0, %v3270_v3  ;;  %v2245_v25 = vsel %vm818_vm9, %v2244_v2, %v2176_v9  ;;  %v2260_v13 = vperm.slane %v2256_v55, %v3270_v3  ;;  %v2275_v16 = vrot.slane %v2254_v6, 4 }
 0x4eb   : > { %v2249_v18 = vperm.slane %v2245_v25, %v3270_v3  ;;  %v2263_v19 = vrot.slane %v2243_v24, 4  ;;  %v2194_v61 = vperm.slane %v2186_v23, %v3270_v3 }
 0x4ec   : > { %v2276_v20 = vsel %vm818_vm9, %v2260_v13, %v2275_v16  ;;  %v2273_v27 = vrot.slane %v2260_v13, 4  ;;  %v2209_v7 = vrot.slane %v2190_v11, 4 }
 0x4ed   : > { %v2124_v31 = vpop.f32.mrf.mxu2  ;;  %v2264_v29 = vsel %vm818_vm9, %v2249_v18, %v2263_v19  ;;  %v2284_v32 = vperm.slane %v2276_v20, %v3286_v17  ;;  %v2261_v26 = vrot.slane %v2249_v18, 4  ;;  %v2221_v45 = vrot.slane %v2194_v61, 4 }
 0x4ee   : > { %v2195_v28 = vrot.slane %v2124_v31, 4  ;;  %v2272_v35 = vperm.slane %v2264_v29, %v3286_v17  ;;  %v2274_v36 = vsel %vm818_vm9, %v2273_v27, %v2254_v6 }
 0x4ef   : > { %v2078_v34 = vpop.f32.mrf.mxu0  ;;  %v2289_v39 = vrot.slane %v2284_v32, 4  ;;  %v2262_v40 = vsel %vm818_vm9, %v2261_v26, %v2243_v24  ;;  %v2280_v44 = vperm.slane %v2274_v36, %v3286_v17 }
 0x4f0   : > { %v2196_v37 = vsel %vm818_vm9, %v2195_v28, %v2078_v34  ;;  %v2197_v22 = vrot.slane %v2078_v34, 4  ;;  %v2291_v43 = vrot.slane %v2272_v35, 4  ;;  %v2268_v30 = vperm.slane %v2262_v40, %v3286_v17  ;;  %v2382_v40 = vld [vmem:[%s3880_s20 + $0x18] sm:$0xff] }
 0x4f1   : > { %v2202_v41 = vperm.slane %v2196_v37, %v3270_v3  ;;  %v2290_v47 = vsel %vm818_vm9, %v2289_v39, %v2272_v35  ;;  %v2285_v59 = vrot.slane %v2280_v44, 4  ;;  %2405 = vmatpush.msrb.mxu3 %v2382_v40 }
 0x4f2   : > { %v2198_v46 = vsel %vm818_vm9, %v2124_v31, %v2197_v22  ;;  %2357 = vrot.lane.b32.xlu2 %v2290_v47, %s3050_s27  ;;  %v2292_v54 = vsel %vm818_vm9, %v2284_v32, %v2291_v43  ;;  %v2287_v42 = vrot.slane %v2268_v30, 4  ;;  %v2379_v43 = vld [vmem:[%s3880_s20] sm:$0xff] }
 0x4f3   : > { %v2206_v33 = vperm.slane %v2198_v46, %v3270_v3  ;;  %v2207_v1 = vrot.slane %v2202_v41, 4  ;;  %v2210_v14 = vsel %vm818_vm9, %v2202_v41, %v2209_v7  ;;  %2365 = vrot.lane.b32.xlu1 %v2292_v54, %s3051_s25  ;;  %v2286_v57 = vsel %vm818_vm9, %v2285_v59, %v2268_v30  ;;  %v2381_v41 = vld [vmem:[%s3880_s20 + $0x10] sm:$0xff] }
 0x4f4   : > { %v2218_v38 = vperm.slane %v2210_v14, %v3286_v17  ;;  %v2288_v53 = vsel %vm818_vm9, %v2280_v44, %v2287_v42  ;;  %2406 = vmatpush.msrb.mxu3 %v2381_v41 }
 0x4f5   : > { %v2208_v48 = vsel %vm818_vm9, %v2207_v1, %v2190_v11  ;;  %v2219_v50 = vrot.slane %v2206_v33, 4  ;;  %v2222_v51 = vsel %vm818_vm9, %v2206_v33, %v2221_v45  ;;  %2349 = vrot.lane.b32.xlu0 %v2288_v53, %s3052_s19 }
 0x4f6   : > { %v2214_v21 = vperm.slane %v2208_v48, %v3286_v17  ;;  %v2230_v15 = vperm.slane %v2222_v51, %v3286_v17  ;;  %v2233_v52 = vrot.slane %v2218_v38, 4  ;;  %v2929_v48 = vld [vmem:[%s3881_s30] ss:$0 sm:$0xff] }
 0x4f7   : > { %v2220_v56 = vsel %vm818_vm9, %v2219_v50, %v2194_v61 }
 0x4f8   : > { %v2226_v60 = vperm.slane %v2220_v56, %v3286_v17  ;;  %v2231_v62 = vrot.slane %v2214_v21, 4  ;;  %v2234_v63 = vsel %vm818_vm9, 0.0, %v2233_v52  ;;  %v2237_v49 = vrot.slane %v2230_v15, 4 }
 0x4f9   : > { %v2293_v0 = vsel %vm818_vm9, %v2233_v52, %v2214_v21  ;;  %v2298_v8 = vrot.slane %v2234_v63, 4  ;;  %v2984_v21 = vld [vmem:[#allocation2] sm:$0xff] }
 0x4fa   : > { %v2232_v4 = vsel %vm818_vm9, 0.0, %v2231_v62  ;;  %v2235_v10 = vrot.slane %v2226_v60, 4  ;;  %v2238_v5 = vsel %vm818_vm9, 0.0, %v2237_v49  ;;  %v2297_v6 = vperm.slane %v2293_v0, %v3270_v3 }
 0x4fb   : > { %v2309_v2 = vrot.slane %v2238_v5, 4  ;;  %v2299_v58 = vsel %vm818_vm9, %v2298_v8, %v2232_v4  ;;  %v2304_v23 = vsel %vm818_vm9, %v2237_v49, %v2226_v60 }
 0x4fc   : > { %v2236_v9 = vsel %vm818_vm9, 0.0, %v2235_v10  ;;  %v2303_v24 = vperm.slane %v2299_v58, %v3270_v3  ;;  %v2308_v55 = vperm.slane %v2304_v23, %v3270_v3  ;;  %v2317_v11 = vrot.slane %v2297_v6, 4 }
 0x4fd   : > { %v2310_v25 = vsel %vm818_vm9, %v2309_v2, %v2236_v9 }
 0x4fe   : > { %v2314_v13 = vperm.slane %v2310_v25, %v3270_v3  ;;  %v2318_v16 = vsel %vm818_vm9, %v2303_v24, %v2317_v11  ;;  %v2329_v18 = vrot.slane %v2308_v55, 4  ;;  %v2315_v19 = vrot.slane %v2303_v24, 4  ;;  %v2477_v24 = vld [vmem:[%s3193_s4 + $0x18] sm:$0xff]  ;;  %v2476_v11 = vld [vmem:[%s3193_s4 + $0x10] sm:$0xff]  ;;  %v2475_v25 = vld [vmem:[%s3193_s4 + $0x8] sm:$0xff] }
 0x4ff   : > { %v2326_v61 = vperm.slane %v2318_v16, %v3286_v17  ;;  %2500 = vmatpush.msrb.mxu0 %v2477_v24 }
 0x500   : > { %v2330_v31 = vsel %vm818_vm9, %v2314_v13, %v2329_v18  ;;  %v2316_v20 = vsel %vm818_vm9, %v2315_v19, %v2297_v6  ;;  %v2327_v27 = vrot.slane %v2314_v13, 4  ;;  %v2474_v13 = vld [vmem:[%s3193_s4] sm:$0xff] }
 0x501   : > { %v2338_v28 = vperm.slane %v2330_v31, %v3286_v17  ;;  %v2345_v29 = vrot.slane %v2326_v61, 4  ;;  %v2322_v32 = vperm.slane %v2316_v20, %v3286_v17  ;;  %2501 = vmatpush.msrb.mxu0 %v2476_v11 }
 0x502   : > { %v2328_v3 = vsel %vm818_vm9, %v2327_v27, %v2308_v55  ;;  %v2930_v27 = vld [vmem:[%s664_s1] ss:$0 sm:$0xff] }
 0x503   : > { %v2346_v26 = vsel %vm818_vm9, %v2338_v28, %v2345_v29  ;;  %v2334_v7 = vperm.slane %v2328_v3, %v3286_v17  ;;  %v2341_v34 = vrot.slane %v2322_v32, 4  ;;  %v2343_v22 = vrot.slane %v2338_v28, 4  ;;  %v2380_v17 = vld [vmem:[%s3880_s20 + $0x8] sm:$0xff]  ;;  %2502 = vmatpush.msrb.mxu0 %v2475_v25 }
 0x504   : > { %2367 = vrot.lane.b32.xlu2 %v2346_v26, %s3051_s25  ;;  %2407 = vmatpush.msrb.mxu3 %v2380_v17  ;;  %v2931_v26 = vld [vmem:[%s667_s28] ss:$0 sm:$0xff] }
 0x505   : > { %v2339_v35 = vrot.slane %v2334_v7, 4  ;;  %v2342_v36 = vsel %vm818_vm9, %v2334_v7, %v2341_v34  ;;  %v2344_v39 = vsel %vm818_vm9, %v2343_v22, %v2326_v61  ;;  %2503 = vmatpush.msrb.mxu0 %v2474_v13 }
 0x506   : > { %2351 = vrot.lane.b32.xlu0 %v2342_v36, %s3052_s19  ;;  %2408 = vmatpush.msrb.mxu3 %v2379_v43 }
 0x507   : > { %v2340_v37 = vsel %vm818_vm9, %v2339_v35, %v2322_v32 }
 0x50e   : > { %2359 = vrot.lane.b32.xlu0 %v2344_v39, %s3050_s27 }
 0x54c   : > { %v2358_v44 = vpop.permute.xlu2 %2357 }
 0x55e   : > { %v2368_v38 = vpop.permute.xlu2 %2367 }
 0x565   : > { %v2366_v46 = vpop.permute.xlu1 %2365 }
 0x567   : > { %v2350_v30 = vpop.permute.xlu0 %2349 }
 0x568   : > { %v2371_v45 = vsel %vm1526_vm10, %v2286_v57, %v2350_v30  ;;  %v2985_v57 = vld [vmem:[#allocation2 + $0x8] sm:$0xff] }
 0x569   : > { %v2374_v47 = vsel %vm2373_vm2, %v2371_v45, %v2358_v44  ;;  %v2568_v44 = vld [vmem:[%s3203_s22 + $0x78] sm:$0xff]  ;;  %v2567_v45 = vld [vmem:[%s3203_s22 + $0x70] sm:$0xff] }
 0x56a   : > { %v2377_v33 = vsel %vm2376_vm3, %v2374_v47, %v2366_v46  ;;  %2573 = vmatpush.msra.mxu1 %v2568_v44  ;;  %v2566_v46 = vld [vmem:[%s3203_s22 + $0x68] sm:$0xff]  ;;  %v2565_v47 = vld [vmem:[%s3203_s22 + $0x60] sm:$0xff] }
 0x56b   : > { %2846 = vmatmul.msk.f32.vlgmr.msrb.gmra.mxu3 %vm696_vm1, %v2377_v33  ;;  %v2564_v33 = vld [vmem:[%s3203_s22 + $0x58] sm:$0xff] }
 0x56c   : > { %2574 = vmatpush.msra.mxu1 %v2567_v45 }
 0x56e   : > { %2575 = vmatpush.msra.mxu1 %v2566_v46 }
 0x570   : > { %2576 = vmatpush.msra.mxu1 %v2565_v47 }
 0x572   : > { %2577 = vmatpush.msra.mxu1 %v2564_v33 }
 0x578   : > { %v2352_v1 = vpop.permute.xlu0 %2351 }
 0x579   : > { %v2372_v14 = vsel %vm1526_vm10, %v2340_v37, %v2352_v1  ;;  %v2563_v1 = vld [vmem:[%s3203_s22 + $0x50] sm:$0xff] }
 0x57a   : > { %2578 = vmatpush.msra.mxu1 %v2563_v1 }
 0x580   : > { %v2360_v54 = vpop.permute.xlu0 %2359 }
 0x581   : > { %v2375_v59 = vsel %vm2373_vm2, %v2372_v14, %v2360_v54  ;;  %v2562_v14 = vld [vmem:[%s3203_s22 + $0x48] sm:$0xff]  ;;  %v2932_v54 = vld [vmem:[%s675_s6] ss:$0 sm:$0xff] }
 0x582   : > { %v2378_v42 = vsel %vm2376_vm3, %v2375_v59, %v2368_v38  ;;  %2579 = vmatpush.msra.mxu1 %v2562_v14  ;;  %v2561_v38 = vld [vmem:[%s3203_s22 + $0x40] sm:$0xff]  ;;  %v2560_v59 = vld [vmem:[%s3203_s22 + $0x38] sm:$0xff] }
 0x583   : > { %2847 = vmatmul.msk.f32.gmra.mxu3 %vm696_vm1, %v2378_v42 }
 0x584   : > { %2580 = vmatpush.msra.mxu1 %v2561_v38 }
 0x586   : > { %2581 = vmatpush.msra.mxu1 %v2560_v59 }
 0x5ee   : > { %v2410_v50 = vpop.f32.mrf.mxu3 }
 0x5ef   : > { %v2411_v51 = vadd.f32 %v2929_v48, %v2410_v50  ;;  %v2559_v50 = vld [vmem:[%s3203_s22 + $0x30] sm:$0xff] }
 0x5f0   : > { %2582 = vmatpush.msra.mxu1 %v2559_v50 }
 0x5f1   : > { %v3766_v15 = vadd.f32 %v2984_v21, %v2411_v51  ;;  %v2558_v21 = vld [vmem:[%s3203_s22 + $0x28] sm:$0xff] }
 0x5f2   : > { %2583 = vmatpush.msra.mxu1 %v2558_v21 }
 0x5f3   : > { %v2418_v52 = vsel %vm696_vm1, %v3766_v15, 0.0 }
 0x5f4   : > { %2419 = vadd.xlane.f32.xlu1 %v2418_v52 }
 0x606   : > { %v2413_v53 = vpop.f32.mrf.mxu3 }
 0x607   : > { %v2414_v56 = vadd.f32 %v2929_v48, %v2413_v53  ;;  %v2557_v53 = vld [vmem:[%s3203_s22 + $0x20] sm:$0xff] }
 0x608   : > { %2584 = vmatpush.msra.mxu1 %v2557_v53 }
 0x609   : > { %v3770_v60 = vadd.f32 %v2985_v57, %v2414_v56  ;;  %v2556_v56 = vld [vmem:[%s3203_s22 + $0x18] sm:$0xff]  ;;  %v2555_v57 = vld [vmem:[%s3203_s22 + $0x10] sm:$0xff] }
 0x60a   : > { %2585 = vmatpush.msra.mxu1 %v2556_v56 }
 0x60b   : > { %v2421_v62 = vsel %vm696_vm1, %v3770_v60, 0.0 }
 0x60c   : > { %2422 = vadd.xlane.f32.xlu0 %v2421_v62  ;;  %v2554_v62 = vld [vmem:[%s3203_s22 + $0x8] sm:$0xff]  ;;  %2586 = vmatpush.msra.mxu1 %v2555_v57 }
 0x60e   : > { %2587 = vmatpush.msra.mxu1 %v2554_v62 }
 0x667   : > { %v2420_v63 = vpop.xlane.xlu1 %2419 }
 0x668   : > { %v2424_v49 = vmul.f32 %v2420_v63, %v3218_v12  ;;  %v2553_v63 = vld [vmem:[%s3203_s22] sm:$0xff] }
 0x669   : > { %2588 = vmatpush.msra.mxu1 %v2553_v63 }
 0x66a   : > { %v2426_v0 = vsub.f32 %v3766_v15, %v2424_v49 }
 0x66c   : > { %v2428_v8 = vmul.f32 %v2426_v0, %v2426_v0 }
 0x66e   : > { %v2430_v4 = vsel %vm696_vm1, %v2428_v8, 0.0 }
 0x66f   : > { %2431 = vadd.xlane.f32.xlu2 %v2430_v4 }
 0x67f   : > { %v2423_v10 = vpop.xlane.xlu0 %2422 }
 0x680   : > { %v2425_v5 = vmul.f32 %v2423_v10, %v3218_v12 }
 0x682   : > { %v2427_v6 = vsub.f32 %v3770_v60, %v2425_v5 }
 0x684   : > { %v2429_v2 = vmul.f32 %v2427_v6, %v2427_v6 }
 0x686   : > { %v2433_v58 = vsel %vm696_vm1, %v2429_v2, 0.0 }
 0x687   : > { %2434 = vadd.xlane.f32.xlu1 %v2433_v58 }
 0x6e2   : > { %v2432_v23 = vpop.xlane.xlu2 %2431 }
 0x6e3   : > { %v2436_v9 = vmul.f32 %v2432_v23, %v3218_v12 }
 0x6e5   : > { %v2438_v55 = vadd.f32 1e-05, %v2436_v9 }
 0x6e7   : > { %2972 = vrsqrt.f32 %v2438_v55  ;;  %vm2446_vm10 = vweird.f32 %v2438_v55 }
 0x6ed   : > { %v2973_v16 = vpop.eup %2972 }
 0x6ee   : > { %v2441_v18 = vmul.f32 %v2973_v16, %v2438_v55  ;;  %vm2447_vm9 = vweird.f32 %v2973_v16 }
 0x6ef   : > { %vm2448_vm4 = vmor %vm2446_vm10, %vm2447_vm9 }
 0x6f0   : > { %v2442_v19 = vmul.f32 %v2973_v16, %v2441_v18 }
 0x6f2   : > { %v2443_v61 = vmul.f32 0.5, %v2442_v19 }
 0x6f4   : > { %v2444_v31 = vsub.f32 1.5, %v2443_v61 }
 0x6f6   : > { %v2445_v20 = vmul.f32 %v2973_v16, %v2444_v31 }
 0x6f8   : > { %v2449_v28 = vsel %vm2448_vm4, %v2973_v16, %v2445_v20 }
 0x6f9   : > { %v2460_v32 = vmul.f32 %v2449_v28, %v2426_v0 }
 0x6fa   : > { %v2435_v29 = vpop.xlane.xlu1 %2434 }
 0x6fb   : > { %v2437_v3 = vmul.f32 %v2435_v29, %v3218_v12  ;;  %v2466_v7 = vmul.f32 %v2930_v27, %v2460_v32 }
 0x6fd   : > { %v2439_v34 = vadd.f32 1e-05, %v2437_v3  ;;  %v2472_v35 = vadd.f32 %v2931_v26, %v2466_v7 }
 0x6ff   : > { %2974 = vrsqrt.f32 %v2439_v34  ;;  %2848 = vmatmul.msk.f32.vlgmr.msrb.gmra.mxu0 %vm696_vm1, %v2472_v35  ;;  %vm2456_vm6 = vweird.f32 %v2439_v34  ;;  %v2933_v35 = vld [vmem:[%s683_s26] ss:$0 sm:$0xff] }
 0x705   : > { %v2975_v36 = vpop.eup %2974 }
 0x706   : > { %v2451_v37 = vmul.f32 %v2975_v36, %v2439_v34  ;;  %vm2457_vm5 = vweird.f32 %v2975_v36 }
 0x707   : > { %vm2458_vm7 = vmor %vm2456_vm6, %vm2457_vm5 }
 0x708   : > { %v2452_v22 = vmul.f32 %v2975_v36, %v2451_v37 }
 0x70a   : > { %v2453_v39 = vmul.f32 0.5, %v2452_v22 }
 0x70c   : > { %v2454_v40 = vsub.f32 1.5, %v2453_v39 }
 0x70e   : > { %v2455_v12 = vmul.f32 %v2975_v36, %v2454_v40 }
 0x710   : > { %v2459_v41 = vsel %vm2458_vm7, %v2975_v36, %v2455_v12 }
 0x711   : > { %v2461_v17 = vmul.f32 %v2459_v41, %v2427_v6 }
 0x713   : > { %v2467_v43 = vmul.f32 %v2930_v27, %v2461_v17 }
 0x715   : > { %v2473_v30 = vadd.f32 %v2931_v26, %v2467_v43 }
 0x717   : > { %2849 = vmatmul.msk.f32.gmra.mxu0 %vm696_vm1, %v2473_v30 }
 0x77c   : > { %v2505_v42 = vpop.f32.mrf.mxu0 }
 0x77d   : > { %v2506_v48 = vadd.f32 %v2932_v54, %v2505_v42 }
 0x77f   : > { %v2850_v51 = vmul.f32 -1.702, %v2506_v48 }
 0x781   : > { %v2515_v52 = vmul.f32 1.442695, %v2850_v51 }
 0x783   : > { %2976 = vpow2.f32 %v2515_v52 }
 0x789   : > { %v2977_v49 = vpop.eup %2976 }
 0x78a   : > { %v2519_v0 = vadd.f32 1.0, %v2977_v49 }
 0x78c   : > { %2978 = vrcp.f32 %v2519_v0  ;;  %v2532_v58 = vand.u32 2147483648, %v2519_v0  ;;  %v2530_v9 = vand.u32 2147483647, %v2519_v0  ;;  %vm2526_vm11 = vweird.f32 %v2519_v0 }
 0x78e   : > { %v2533_v11 = vor.u32 1.1754944e-38, %v2532_v58  ;;  %vm2531_vm13 = vcmp.eq.f32.partialorder %v2530_v9, 8.507059e+37 }
 0x792   : > { %v2979_v8 = vpop.eup %2978 }
 0x793   : > { %v2522_v10 = vmul.f32 %v2979_v8, %v2519_v0  ;;  %vm2527_vm8 = vweird.f32 %v2979_v8 }
 0x794   : > { %v2508_v4 = vpop.f32.mrf.mxu0  ;;  %vm2528_vm12 = vmor %vm2526_vm11, %vm2527_vm8 }
 0x795   : > { %v2509_v5 = vadd.f32 %v2932_v54, %v2508_v4  ;;  %v2523_v6 = vsub.f32 1.0, %v2522_v10 }
 0x797   : > { %v2851_v2 = vmul.f32 -1.702, %v2509_v5  ;;  %v2524_v23 = vmul.f32 %v2979_v8, %v2523_v6 }
 0x799   : > { %v2517_v24 = vmul.f32 1.442695, %v2851_v2  ;;  %v2525_v55 = vadd.f32 %v2979_v8, %v2524_v23 }
 0x79b   : > { %2980 = vpow2.f32 %v2517_v24  ;;  %v2529_v25 = vsel %vm2528_vm12, %v2979_v8, %v2525_v55 }
 0x79c   : > { %v2534_v13 = vsel %vm2531_vm13, %v2533_v11, %v2529_v25 }
 0x79d   : > { %v2551_v16 = vmul.f32 %v2534_v13, %v2506_v48 }
 0x79f   : > { %2589 = vmatmul.f32.vlgmr.msra.gmra.mxu1 %v2551_v16 }
 0x7a1   : > { %v2981_v18 = vpop.eup %2980 }
 0x7a2   : > { %v2520_v19 = vadd.f32 1.0, %v2981_v18 }
 0x7a4   : > { %2982 = vrcp.f32 %v2520_v19  ;;  %v2547_v27 = vand.u32 2147483648, %v2520_v19  ;;  %v2545_v29 = vand.u32 2147483647, %v2520_v19  ;;  %vm2541_vm15 = vweird.f32 %v2520_v19 }
 0x7a6   : > { %v2548_v3 = vor.u32 1.1754944e-38, %v2547_v27  ;;  %vm2546_vm2 = vcmp.eq.f32.partialorder %v2545_v29, 8.507059e+37 }
 0x7aa   : > { %v2983_v61 = vpop.eup %2982 }
 0x7ab   : > { %v2537_v31 = vmul.f32 %v2983_v61, %v2520_v19  ;;  %vm2542_vm14 = vweird.f32 %v2983_v61 }
 0x7ac   : > { %vm2543_vm0 = vmor %vm2541_vm15, %vm2542_vm14 }
 0x7ad   : > { %v2538_v20 = vsub.f32 1.0, %v2537_v31 }
 0x7af   : > { %v2539_v28 = vmul.f32 %v2983_v61, %v2538_v20 }
 0x7b1   : > { %v2540_v32 = vadd.f32 %v2983_v61, %v2539_v28 }
 0x7b3   : > { %v2544_v26 = vsel %vm2543_vm0, %v2983_v61, %v2540_v32 }
 0x7b4   : > { %v2549_v7 = vsel %vm2546_vm2, %v2548_v3, %v2544_v26 }
 0x7b5   : > { %v2552_v34 = vmul.f32 %v2549_v7, %v2509_v5 }
 0x7b7   : > { %2592 = vmatmul.f32.gmra.mxu1 %v2552_v34 }
 0x81c   : > { %v2590_v36 = vpop.f32.mrf.mxu1 }
 0x81d   : > { %v2591_v37 = vadd.f32 %v2933_v35, %v2590_v36 }
 0x81f   : > { %v2596_v22 = vadd.f32 %v2591_v37, %v3766_v15 }
 0x821   : > { %2598 = vst.msk [vmem:[#allocation2] sm:$0xff] %vm696_vm1, %v2596_v22 }
 0x834   : > { %v2593_v39 = vpop.f32.mrf.mxu1 }
 0x835   : > { %v2594_v40 = vadd.f32 %v2933_v35, %v2593_v39  ;;  %2603 = sbr.rel (%p2852_p6) target bundleno = 2108 (0x83c), region = 84 }
 0x837   : > { %v2597_v12 = vadd.f32 %v2594_v40, %v3770_v60 }
 0x839   : > { %2599 = vst.msk [vmem:[#allocation2 + $0x8] sm:$0xff] %vm696_vm1, %v2597_v12 }
 0x83a   : > { %2604 = vst.msk [vmem:[#allocation3] sm:$0xff] %vm696_vm1, %v2596_v22 }
 0x83b   : > { %2605 = vst.msk [vmem:[#allocation3 + $0x8] sm:$0xff] %vm696_vm1, %v2597_v12 }
 0x83c PF: > { %s3882_s18 = sld [smem:[#allocation7_spill]]  ;;  %s3053_s14 = smov [#allocation3]  }
 0x83d   : > { %s3884_s25 = sld [smem:[#allocation13_spill]]  ;;  %s2614_s16 = sshll.u32 %s3053_s14, 4  ;;  %s2615_s16 = int_to_ptr.vmem [resolvable:$true] %s2614_s16 }
 0x83e   : > { %s3054_s30 = smov 128  }
 0x842   : > { %s3883_s26 = sadd.s32 4294967295, %s3882_s18  }
 0x843   : > { %p2865_p7 = scmp.eq.s32.totalorder %s3883_s26, 1  ;;  %s2616_s20 = sshll.u32 %s3884_s25, 4  ;;  %s2617_s20 = int_to_ptr.hbm [resolvable:$true] %s2616_s20 }
 0x845   : > { %2862 = dma.vmem_to_hbm [thread:$0]  (%p2865_p7), %s2615_s16, 256, %s2617_s20, [#allocation4], %s3054_s30, %s3054_s30, %s3052_s19  }
 0x846   : > { %3027 = dma.done.wait (%p2865_p7), [#allocation4], 256  }
 0x847   : > { %3029 = vsyncadd (%p2865_p7), [#allocation4], 4294967040 }
 0x848 PF: > { %s3885_s29 = sld [smem:[#allocation7_spill]] }
 0x849   : > { %s3887_s30 = sld [smem:[#allocation8_spill]] }
 0x84e   : > { %s25_s15 = sadd.s32 1, %s3885_s29   ;;  %s3886_s29 = sld [smem:[#allocation6_spill]] }
 0x84f   : > { %p22_p8 = scmp.ge.s32.totalorder %s25_s15, 4  }
 0x851   :  { %24 = sbr.rel (!%p22_p8) target bundleno = 7 (0x7), region = 151 }
 0x856   :  { %2633 = vsyncpa [#allocation4], 1 }
 0x857   :  { %2635 = vsyncpa [#allocation4 + $0x1], 1 }

</bundles_post_ra>
